<compile_context>
chip_gen: v6e
topology: v6e:2x2x1
jax: 0.10.0
libtpu: 0.0.40
codegen_flags: <defaults>
</compile_context>

<pallas_src>
import functools

import jax
import jax.numpy as jnp
from jax import lax
from jax.experimental import pallas as pl
from jax.experimental.pallas import tpu as pltpu


def epi_conv_kernel(x_ref, w1_ref, b1_ref, w2_ref, b2_ref, w3_ref, b3_ref,
                    out_ref, xpad_ref, x3pad_ref, *, Cin, G, W, NB):
    f32 = jnp.float32
    Wp = W + 6                      # per-batch lane segment (3-column halo each side)
    L = NB * Wp                     # packed lane width
    Lc = L - 6                      # compute width (xpad columns 3 .. L-4)

    # Zero the halo-carrying scratches (cheap memset; correct for every grid step / core).
    xpad_ref[...] = jnp.zeros_like(xpad_ref)
    x3pad_ref[...] = jnp.zeros_like(x3pad_ref)

    # ---- repack the NCHW block into the lane-packed, width-padded layout ----
    # xpad rows are ordered h*Cin + ic; batch b's data sits at columns [b*Wp+3, b*Wp+3+W).
    for h in range(3):
        for b in range(NB):
            xpad_ref[h * Cin:(h + 1) * Cin, b * Wp + 3:b * Wp + 3 + W] = (
                x_ref[b, :, h, :].astype(f32))
    xpad = xpad_ref[...]                                        # [3*Cin, L]

    # Lane mask in compute coords: 1 on real data columns, 0 on inter-batch halo columns.
    col = lax.broadcasted_iota(jnp.int32, (1, Lc), 1) + 3
    valid = (col >= 3) & (col < 3 + W)
    for b in range(1, NB):
        lo = b * Wp + 3
        valid = valid | ((col >= lo) & (col < lo + W))
    mask = valid.astype(f32)                                    # [1, Lc]

    # ---- conv_1: (3,1) valid conv over H=3  ->  a single matmul over (h, ic) ----
    y1 = jnp.dot(w1_ref[...], xpad[:, 3:3 + Lc],
                 preferred_element_type=f32) + b1_ref[...]
    y1 = jnp.maximum(y1, 0.0)                                   # [3G, Lc], rows k*G + g

    b2 = b2_ref[...]                                            # [G, 1]
    b3 = b3_ref[...]                                            # [G, 1]

    # ---- conv_2: (1,7) conv as ONE im2col matmul per height row; x3 = x1 + x2 ----
    for h in range(3):
        a2 = jnp.concatenate(
            [xpad[h * Cin:(h + 1) * Cin, kw:kw + Lc] for kw in range(7)], axis=0)  # [7Cin, Lc]
        y2 = jnp.maximum(jnp.dot(w2_ref[...], a2, preferred_element_type=f32) + b2, 0.0)
        x3 = (y1[h * G:(h + 1) * G, :] + y2) * mask             # zero the halo columns
        x3pad_ref[(h + 1) * G:(h + 2) * G, 3:3 + Lc] = x3
    x3pad = x3pad_ref[...]                                      # [5G, L], zero height/width halos

    # ---- torch.cat((x, out), 1): the x part is one straight full-block copy ----
    out_ref[:, 0:Cin, :, :] = x_ref[...]

    # ---- conv: (3,3) conv (padding 1) as ONE im2col matmul per output height row ----
    for h in range(3):
        a3 = jnp.concatenate(
            [x3pad[(h + kh) * G:(h + kh + 1) * G, kw + 2:kw + 2 + Lc]
             for kh in range(3) for kw in range(3)], axis=0)    # [9G, Lc]
        y3 = jnp.dot(w3_ref[...], a3, preferred_element_type=f32) + b3   # [G, Lc]
        for b in range(NB):
            out_ref[b, Cin:Cin + G, h, :] = (
                y3[:, b * Wp:b * Wp + W].astype(out_ref.dtype))


def epi_conv(x, W1, b1, W2, b2, W3, b3, batch_block=None):
    """x: [B, Cin, 3, W] (NCHW).  Returns [B, Cin+G, 3, W] (NCHW), matching PyTorch."""
    B, Cin, H, W = x.shape
    assert H == 3, "EPI_Conv's reshape requires H == 3"
    G = W1.shape[0] // 3
    Wp = W + 6

    if batch_block is None:
        cap = max(1, 256 // Wp)     # pack batches until ~2 vregs worth of lanes per step
        batch_block = next(nb for nb in range(min(B, cap), 0, -1) if B % nb == 0)
    NB = batch_block
    assert B % NB == 0

    # --- pre-flatten weights to 2-D lane-friendly matmul operands (im2col layouts) ---
    # conv_1: cols = kh*Cin+ic ; rows permuted g*3+k -> k*G+g so that the PyTorch
    # reshape([B, G, 3, W]) of its output becomes a contiguous row slice per height.
    w1f = jnp.transpose(W1[..., 0], (0, 2, 1)).reshape(3 * G, 3 * Cin)
    w1p = w1f.reshape(G, 3, 3 * Cin).transpose(1, 0, 2).reshape(3 * G, 3 * Cin)
    b1p = b1.reshape(G, 3).T.reshape(3 * G, 1)
    # conv_2: [G, 7*Cin], cols = kw*Cin + ic   (matches the kernel's im2col row order)
    w2f = jnp.transpose(W2[:, :, 0, :], (0, 2, 1)).reshape(G, 7 * Cin)
    b2k = b2.reshape(G, 1)
    # conv (3,3): [G, 9*G], cols = (kh*3+kw)*G + ic
    w3f = jnp.transpose(W3, (0, 2, 3, 1)).reshape(G, 9 * G)
    b3k = b3.reshape(G, 1)

    kern = functools.partial(epi_conv_kernel, Cin=Cin, G=G, W=W, NB=NB)
    return pl.pallas_call(
        kern,
        out_shape=jax.ShapeDtypeStruct((B, Cin + G, 3, W), x.dtype),
        grid=(B // NB,),
        in_specs=[
            pl.BlockSpec((NB, Cin, 3, W), lambda i: (i, 0, 0, 0)),
            pl.BlockSpec((3 * G, 3 * Cin), lambda i: (0, 0)),
            pl.BlockSpec((3 * G, 1), lambda i: (0, 0)),
            pl.BlockSpec((G, 7 * Cin), lambda i: (0, 0)),
            pl.BlockSpec((G, 1), lambda i: (0, 0)),
            pl.BlockSpec((G, 9 * G), lambda i: (0, 0)),
            pl.BlockSpec((G, 1), lambda i: (0, 0)),
        ],
        out_specs=pl.BlockSpec((NB, Cin + G, 3, W), lambda i: (i, 0, 0, 0)),
        scratch_shapes=[
            pltpu.VMEM((3 * Cin, NB * Wp), jnp.float32),   # width-padded, batch-packed x
            pltpu.VMEM((5 * G, NB * Wp), jnp.float32),     # zero-halo x3 for the 3x3 conv
        ],
        compiler_params=pltpu.CompilerParams(dimension_semantics=("parallel",)),
    )(x, w1p, b1p, w2f, b2k, w3f, b3k)


def ref_forward(x, W1, b1, W2, b2, W3, b3):
    """Pure-JAX reference (mirrors the PyTorch forward exactly)."""
    dn = ("NCHW", "OIHW", "NCHW")
    x1 = lax.conv_general_dilated(x, W1, (1, 1), [(0, 0), (0, 0)], dimension_numbers=dn)
    x1 = jnp.maximum(x1 + b1[None, :, None, None], 0.0)
    x2 = lax.conv_general_dilated(x, W2, (1, 1), [(0, 0), (3, 3)], dimension_numbers=dn)
    x2 = jnp.maximum(x2 + b2[None, :, None, None], 0.0)
    B, C, _, Wd = x1.shape
    x1 = x1.reshape(B, C // 3, 3, Wd)
    x3 = x1 + x2
    out = lax.conv_general_dilated(x3, W3, (1, 1), [(1, 1), (1, 1)], dimension_numbers=dn)
    out = out + b3[None, :, None, None]
    return jnp.concatenate([x, out], axis=1)


if __name__ == "__main__":
    B, Cin, H, W = 2, 8, 3, 16
    G = 8

    key = jax.random.PRNGKey(0)
    ks = jax.random.split(key, 7)
    x = jax.random.normal(ks[0], (B, Cin, H, W), jnp.float32)
    # deterministic synthetic parameters (shapes from EPI_Conv.__init__)
    W1 = jax.random.normal(ks[1], (3 * G, Cin, 3, 1), jnp.float32) * 0.1   # conv_1
    b1 = jax.random.normal(ks[2], (3 * G,), jnp.float32) * 0.1
    W2 = jax.random.normal(ks[3], (G, Cin, 1, 7), jnp.float32) * 0.1       # conv_2
    b2 = jax.random.normal(ks[4], (G,), jnp.float32) * 0.1
    W3 = jax.random.normal(ks[5], (G, G, 3, 3), jnp.float32) * 0.1         # conv
    b3 = jax.random.normal(ks[6], (G,), jnp.float32) * 0.1

    out = jax.block_until_ready(epi_conv(x, W1, b1, W2, b2, W3, b3))
    ref = ref_forward(x, W1, b1, W2, b2, W3, b3)

    assert out.shape == (B, Cin + G, H, W), out.shape
    assert jnp.allclose(out, ref, atol=1e-4, rtol=1e-4), float(jnp.max(jnp.abs(out - ref)))
    print("KERNEL_OK")
</pallas_src>

<mosaic_0001>
module attributes {stable_mosaic.version = 11 : i64} {
  func.func @epi_conv_kernel(%arg0: i32, %arg1: memref<2x8x3x16xf32, #tpu.memory_space<vmem>>, %arg2: memref<24x24xf32, #tpu.memory_space<vmem>>, %arg3: memref<24x1xf32, #tpu.memory_space<vmem>>, %arg4: memref<8x56xf32, #tpu.memory_space<vmem>>, %arg5: memref<8x1xf32, #tpu.memory_space<vmem>>, %arg6: memref<8x72xf32, #tpu.memory_space<vmem>>, %arg7: memref<8x1xf32, #tpu.memory_space<vmem>>, %arg8: memref<2x16x3x16xf32, #tpu.memory_space<vmem>>, %arg9: memref<24x44xf32, #tpu.memory_space<vmem>>, %arg10: memref<40x44xf32, #tpu.memory_space<vmem>>) attributes {dimension_semantics = [#tpu.dimension_semantics<parallel>], iteration_bounds = array<i64: 1>, scalar_prefetch = 0 : i64, scratch_operands = 2 : i64, tpu.core_type = #tpu.core_type<tc>, window_params = [{transform_indices = @transform_0, window_bounds = array<i64: 2, 8, 3, 16>}, {pipeline_mode = #tpu.pipeline_mode<synchronous>, transform_indices = @transform_1, window_bounds = array<i64: 24, 24>}, {pipeline_mode = #tpu.pipeline_mode<synchronous>, transform_indices = @transform_2, window_bounds = array<i64: 24, 1>}, {pipeline_mode = #tpu.pipeline_mode<synchronous>, transform_indices = @transform_3, window_bounds = array<i64: 8, 56>}, {pipeline_mode = #tpu.pipeline_mode<synchronous>, transform_indices = @transform_4, window_bounds = array<i64: 8, 1>}, {pipeline_mode = #tpu.pipeline_mode<synchronous>, transform_indices = @transform_5, window_bounds = array<i64: 8, 72>}, {pipeline_mode = #tpu.pipeline_mode<synchronous>, transform_indices = @transform_6, window_bounds = array<i64: 8, 1>}, {transform_indices = @transform_7, window_bounds = array<i64: 2, 16, 3, 16>}]} {
    %cst = arith.constant 0.000000e+00 : f32
    %0 = vector.broadcast %cst : f32 to vector<24x44xf32>
    %c0 = arith.constant 0 : index
    %c0_0 = arith.constant 0 : index
    %1 = vector.load %arg9[%c0, %c0_0] : memref<24x44xf32, #tpu.memory_space<vmem>>, vector<24x44xf32>
    tpu.vector_store %arg9[%c0, %c0_0], %0 {strides = array<i32>} : memref<24x44xf32, #tpu.memory_space<vmem>>, vector<24x44xf32>,
    %cst_1 = arith.constant 0.000000e+00 : f32
    %2 = vector.broadcast %cst_1 : f32 to vector<40x44xf32>
    %c0_2 = arith.constant 0 : index
    %c0_3 = arith.constant 0 : index
    %3 = vector.load %arg10[%c0_2, %c0_3] : memref<40x44xf32, #tpu.memory_space<vmem>>, vector<40x44xf32>
    tpu.vector_store %arg10[%c0_2, %c0_3], %2 {strides = array<i32>} : memref<40x44xf32, #tpu.memory_space<vmem>>, vector<40x44xf32>,
    %c0_4 = arith.constant 0 : index
    %c0_5 = arith.constant 0 : index
    %c0_6 = arith.constant 0 : index
    %c0_7 = arith.constant 0 : index
    %4 = vector.load %arg1[%c0_4, %c0_5, %c0_6, %c0_7] : memref<2x8x3x16xf32, #tpu.memory_space<vmem>>, vector<1x8x1x16xf32>
    %5 = vector.shape_cast %4 : vector<1x8x1x16xf32> to vector<8x16xf32>
    %c0_8 = arith.constant 0 : index
    %c3 = arith.constant 3 : index
    %6 = vector.load %arg9[%c0_8, %c3] : memref<24x44xf32, #tpu.memory_space<vmem>>, vector<8x16xf32>
    tpu.vector_store %arg9[%c0_8, %c3], %5 {strides = array<i32>} : memref<24x44xf32, #tpu.memory_space<vmem>>, vector<8x16xf32>,
    %c1 = arith.constant 1 : index
    %c0_9 = arith.constant 0 : index
    %c0_10 = arith.constant 0 : index
    %c0_11 = arith.constant 0 : index
    %7 = vector.load %arg1[%c1, %c0_9, %c0_10, %c0_11] : memref<2x8x3x16xf32, #tpu.memory_space<vmem>>, vector<1x8x1x16xf32>
    %8 = vector.shape_cast %7 : vector<1x8x1x16xf32> to vector<8x16xf32>
    %c0_12 = arith.constant 0 : index
    %c25 = arith.constant 25 : index
    %9 = vector.load %arg9[%c0_12, %c25] : memref<24x44xf32, #tpu.memory_space<vmem>>, vector<8x16xf32>
    tpu.vector_store %arg9[%c0_12, %c25], %8 {strides = array<i32>} : memref<24x44xf32, #tpu.memory_space<vmem>>, vector<8x16xf32>,
    %c0_13 = arith.constant 0 : index
    %c0_14 = arith.constant 0 : index
    %c1_15 = arith.constant 1 : index
    %c0_16 = arith.constant 0 : index
    %10 = vector.load %arg1[%c0_13, %c0_14, %c1_15, %c0_16] : memref<2x8x3x16xf32, #tpu.memory_space<vmem>>, vector<1x8x1x16xf32>
    %11 = vector.shape_cast %10 : vector<1x8x1x16xf32> to vector<8x16xf32>
    %c8 = arith.constant 8 : index
    %c3_17 = arith.constant 3 : index
    %12 = vector.load %arg9[%c8, %c3_17] : memref<24x44xf32, #tpu.memory_space<vmem>>, vector<8x16xf32>
    tpu.vector_store %arg9[%c8, %c3_17], %11 {strides = array<i32>} : memref<24x44xf32, #tpu.memory_space<vmem>>, vector<8x16xf32>,
    %c1_18 = arith.constant 1 : index
    %c0_19 = arith.constant 0 : index
    %c1_20 = arith.constant 1 : index
    %c0_21 = arith.constant 0 : index
    %13 = vector.load %arg1[%c1_18, %c0_19, %c1_20, %c0_21] : memref<2x8x3x16xf32, #tpu.memory_space<vmem>>, vector<1x8x1x16xf32>
    %14 = vector.shape_cast %13 : vector<1x8x1x16xf32> to vector<8x16xf32>
    %c8_22 = arith.constant 8 : index
    %c25_23 = arith.constant 25 : index
    %15 = vector.load %arg9[%c8_22, %c25_23] : memref<24x44xf32, #tpu.memory_space<vmem>>, vector<8x16xf32>
    tpu.vector_store %arg9[%c8_22, %c25_23], %14 {strides = array<i32>} : memref<24x44xf32, #tpu.memory_space<vmem>>, vector<8x16xf32>,
    %c0_24 = arith.constant 0 : index
    %c0_25 = arith.constant 0 : index
    %c2 = arith.constant 2 : index
    %c0_26 = arith.constant 0 : index
    %16 = vector.load %arg1[%c0_24, %c0_25, %c2, %c0_26] : memref<2x8x3x16xf32, #tpu.memory_space<vmem>>, vector<1x8x1x16xf32>
    %17 = vector.shape_cast %16 : vector<1x8x1x16xf32> to vector<8x16xf32>
    %c16 = arith.constant 16 : index
    %c3_27 = arith.constant 3 : index
    %18 = vector.load %arg9[%c16, %c3_27] : memref<24x44xf32, #tpu.memory_space<vmem>>, vector<8x16xf32>
    tpu.vector_store %arg9[%c16, %c3_27], %17 {strides = array<i32>} : memref<24x44xf32, #tpu.memory_space<vmem>>, vector<8x16xf32>,
    %c1_28 = arith.constant 1 : index
    %c0_29 = arith.constant 0 : index
    %c2_30 = arith.constant 2 : index
    %c0_31 = arith.constant 0 : index
    %19 = vector.load %arg1[%c1_28, %c0_29, %c2_30, %c0_31] : memref<2x8x3x16xf32, #tpu.memory_space<vmem>>, vector<1x8x1x16xf32>
    %20 = vector.shape_cast %19 : vector<1x8x1x16xf32> to vector<8x16xf32>
    %c16_32 = arith.constant 16 : index
    %c25_33 = arith.constant 25 : index
    %21 = vector.load %arg9[%c16_32, %c25_33] : memref<24x44xf32, #tpu.memory_space<vmem>>, vector<8x16xf32>
    tpu.vector_store %arg9[%c16_32, %c25_33], %20 {strides = array<i32>} : memref<24x44xf32, #tpu.memory_space<vmem>>, vector<8x16xf32>,
    %c0_34 = arith.constant 0 : index
    %c0_35 = arith.constant 0 : index
    %22 = vector.load %arg9[%c0_34, %c0_35] : memref<24x44xf32, #tpu.memory_space<vmem>>, vector<24x44xf32>
    %23 = tpu.iota {dimensions = array<i32: 1>} : vector<1x38xi32>
    %c3_i32 = arith.constant 3 : i32
    %24 = vector.broadcast %c3_i32 : i32 to vector<1x38xi32>
    %25 = arith.addi %23, %24 : vector<1x38xi32>
    %c3_i32_36 = arith.constant 3 : i32
    %26 = vector.broadcast %c3_i32_36 : i32 to vector<1x38xi32>
    %27 = arith.cmpi sge, %25, %26 : vector<1x38xi32>
    %c19_i32 = arith.constant 19 : i32
    %28 = vector.broadcast %c19_i32 : i32 to vector<1x38xi32>
    %29 = arith.cmpi slt, %25, %28 : vector<1x38xi32>
    %30 = arith.andi %27, %29 : vector<1x38xi1>
    %c25_i32 = arith.constant 25 : i32
    %31 = vector.broadcast %c25_i32 : i32 to vector<1x38xi32>
    %32 = arith.cmpi sge, %25, %31 : vector<1x38xi32>
    %c41_i32 = arith.constant 41 : i32
    %33 = vector.broadcast %c41_i32 : i32 to vector<1x38xi32>
    %34 = arith.cmpi slt, %25, %33 : vector<1x38xi32>
    %35 = arith.andi %32, %34 : vector<1x38xi1>
    %36 = arith.ori %30, %35 : vector<1x38xi1>
    %37 = arith.extui %36 : vector<1x38xi1> to vector<1x38xi32>
    %38 = arith.sitofp %37 : vector<1x38xi32> to vector<1x38xf32>
    %c0_37 = arith.constant 0 : index
    %c0_38 = arith.constant 0 : index
    %39 = vector.load %arg2[%c0_37, %c0_38] : memref<24x24xf32, #tpu.memory_space<vmem>>, vector<24x24xf32>
    %40 = vector.extract_strided_slice %22 {offsets = [0, 3], sizes = [24, 38], strides = [1, 1]} : vector<24x44xf32> to vector<24x38xf32>
    %cst_39 = arith.constant dense<0.000000e+00> : vector<24x38xf32>
    %41 = tpu.matmul %39, %40, %cst_39 {dimension_numbers = #tpu.dot_dimension_numbers<[1], [0], [0], [1], [0, 0, 1, 1], [], []>} : vector<24x24xf32>, vector<24x38xf32>, vector<24x38xf32> -> vector<24x38xf32>
    %c0_40 = arith.constant 0 : index
    %c0_41 = arith.constant 0 : index
    %42 = vector.load %arg3[%c0_40, %c0_41] : memref<24x1xf32, #tpu.memory_space<vmem>>, vector<24x1xf32>
    %43 = vector.broadcast %42 : vector<24x1xf32> to vector<24x38xf32>
    %44 = arith.addf %41, %43 : vector<24x38xf32>
    %cst_42 = arith.constant 0.000000e+00 : f32
    %45 = vector.broadcast %cst_42 : f32 to vector<24x38xf32>
    %46 = arith.maximumf %44, %45 : vector<24x38xf32>
    %c0_43 = arith.constant 0 : index
    %c0_44 = arith.constant 0 : index
    %47 = vector.load %arg5[%c0_43, %c0_44] : memref<8x1xf32, #tpu.memory_space<vmem>>, vector<8x1xf32>
    %c0_45 = arith.constant 0 : index
    %c0_46 = arith.constant 0 : index
    %48 = vector.load %arg7[%c0_45, %c0_46] : memref<8x1xf32, #tpu.memory_space<vmem>>, vector<8x1xf32>
    %49 = vector.extract_strided_slice %22 {offsets = [0, 0], sizes = [8, 38], strides = [1, 1]} : vector<24x44xf32> to vector<8x38xf32>
    %50 = vector.extract_strided_slice %22 {offsets = [0, 1], sizes = [8, 38], strides = [1, 1]} : vector<24x44xf32> to vector<8x38xf32>
    %51 = vector.extract_strided_slice %22 {offsets = [0, 2], sizes = [8, 38], strides = [1, 1]} : vector<24x44xf32> to vector<8x38xf32>
    %52 = vector.extract_strided_slice %22 {offsets = [0, 3], sizes = [8, 38], strides = [1, 1]} : vector<24x44xf32> to vector<8x38xf32>
    %53 = vector.extract_strided_slice %22 {offsets = [0, 4], sizes = [8, 38], strides = [1, 1]} : vector<24x44xf32> to vector<8x38xf32>
    %54 = vector.extract_strided_slice %22 {offsets = [0, 5], sizes = [8, 38], strides = [1, 1]} : vector<24x44xf32> to vector<8x38xf32>
    %55 = vector.extract_strided_slice %22 {offsets = [0, 6], sizes = [8, 38], strides = [1, 1]} : vector<24x44xf32> to vector<8x38xf32>
    %56 = tpu.concatenate %49, %50, %51, %52, %53, %54, %55 in 0 : vector<8x38xf32>, vector<8x38xf32>, vector<8x38xf32>, vector<8x38xf32>, vector<8x38xf32>, vector<8x38xf32>, vector<8x38xf32> -> vector<56x38xf32>
    %c0_47 = arith.constant 0 : index
    %c0_48 = arith.constant 0 : index
    %57 = vector.load %arg4[%c0_47, %c0_48] : memref<8x56xf32, #tpu.memory_space<vmem>>, vector<8x56xf32>
    %cst_49 = arith.constant dense<0.000000e+00> : vector<8x38xf32>
    %58 = tpu.matmul %57, %56, %cst_49 {dimension_numbers = #tpu.dot_dimension_numbers<[1], [0], [0], [1], [0, 0, 1, 1], [], []>} : vector<8x56xf32>, vector<56x38xf32>, vector<8x38xf32> -> vector<8x38xf32>
    %59 = vector.broadcast %47 : vector<8x1xf32> to vector<8x38xf32>
    %60 = arith.addf %58, %59 : vector<8x38xf32>
    %cst_50 = arith.constant 0.000000e+00 : f32
    %61 = vector.broadcast %cst_50 : f32 to vector<8x38xf32>
    %62 = arith.maximumf %60, %61 : vector<8x38xf32>
    %63 = vector.extract_strided_slice %46 {offsets = [0, 0], sizes = [8, 38], strides = [1, 1]} : vector<24x38xf32> to vector<8x38xf32>
    %64 = arith.addf %63, %62 : vector<8x38xf32>
    %65 = vector.broadcast %38 : vector<1x38xf32> to vector<8x38xf32>
    %66 = arith.mulf %64, %65 : vector<8x38xf32>
    %c8_51 = arith.constant 8 : index
    %c3_52 = arith.constant 3 : index
    %67 = vector.load %arg10[%c8_51, %c3_52] : memref<40x44xf32, #tpu.memory_space<vmem>>, vector<8x38xf32>
    tpu.vector_store %arg10[%c8_51, %c3_52], %66 {strides = array<i32>} : memref<40x44xf32, #tpu.memory_space<vmem>>, vector<8x38xf32>,
    %68 = vector.extract_strided_slice %22 {offsets = [8, 0], sizes = [8, 38], strides = [1, 1]} : vector<24x44xf32> to vector<8x38xf32>
    %69 = vector.extract_strided_slice %22 {offsets = [8, 1], sizes = [8, 38], strides = [1, 1]} : vector<24x44xf32> to vector<8x38xf32>
    %70 = vector.extract_strided_slice %22 {offsets = [8, 2], sizes = [8, 38], strides = [1, 1]} : vector<24x44xf32> to vector<8x38xf32>
    %71 = vector.extract_strided_slice %22 {offsets = [8, 3], sizes = [8, 38], strides = [1, 1]} : vector<24x44xf32> to vector<8x38xf32>
    %72 = vector.extract_strided_slice %22 {offsets = [8, 4], sizes = [8, 38], strides = [1, 1]} : vector<24x44xf32> to vector<8x38xf32>
    %73 = vector.extract_strided_slice %22 {offsets = [8, 5], sizes = [8, 38], strides = [1, 1]} : vector<24x44xf32> to vector<8x38xf32>
    %74 = vector.extract_strided_slice %22 {offsets = [8, 6], sizes = [8, 38], strides = [1, 1]} : vector<24x44xf32> to vector<8x38xf32>
    %75 = tpu.concatenate %68, %69, %70, %71, %72, %73, %74 in 0 : vector<8x38xf32>, vector<8x38xf32>, vector<8x38xf32>, vector<8x38xf32>, vector<8x38xf32>, vector<8x38xf32>, vector<8x38xf32> -> vector<56x38xf32>
    %c0_53 = arith.constant 0 : index
    %c0_54 = arith.constant 0 : index
    %76 = vector.load %arg4[%c0_53, %c0_54] : memref<8x56xf32, #tpu.memory_space<vmem>>, vector<8x56xf32>
    %cst_55 = arith.constant dense<0.000000e+00> : vector<8x38xf32>
    %77 = tpu.matmul %76, %75, %cst_55 {dimension_numbers = #tpu.dot_dimension_numbers<[1], [0], [0], [1], [0, 0, 1, 1], [], []>} : vector<8x56xf32>, vector<56x38xf32>, vector<8x38xf32> -> vector<8x38xf32>
    %78 = vector.broadcast %47 : vector<8x1xf32> to vector<8x38xf32>
    %79 = arith.addf %77, %78 : vector<8x38xf32>
    %cst_56 = arith.constant 0.000000e+00 : f32
    %80 = vector.broadcast %cst_56 : f32 to vector<8x38xf32>
    %81 = arith.maximumf %79, %80 : vector<8x38xf32>
    %82 = vector.extract_strided_slice %46 {offsets = [8, 0], sizes = [8, 38], strides = [1, 1]} : vector<24x38xf32> to vector<8x38xf32>
    %83 = arith.addf %82, %81 : vector<8x38xf32>
    %84 = vector.broadcast %38 : vector<1x38xf32> to vector<8x38xf32>
    %85 = arith.mulf %83, %84 : vector<8x38xf32>
    %c16_57 = arith.constant 16 : index
    %c3_58 = arith.constant 3 : index
    %86 = vector.load %arg10[%c16_57, %c3_58] : memref<40x44xf32, #tpu.memory_space<vmem>>, vector<8x38xf32>
    tpu.vector_store %arg10[%c16_57, %c3_58], %85 {strides = array<i32>} : memref<40x44xf32, #tpu.memory_space<vmem>>, vector<8x38xf32>,
    %87 = vector.extract_strided_slice %22 {offsets = [16, 0], sizes = [8, 38], strides = [1, 1]} : vector<24x44xf32> to vector<8x38xf32>
    %88 = vector.extract_strided_slice %22 {offsets = [16, 1], sizes = [8, 38], strides = [1, 1]} : vector<24x44xf32> to vector<8x38xf32>
    %89 = vector.extract_strided_slice %22 {offsets = [16, 2], sizes = [8, 38], strides = [1, 1]} : vector<24x44xf32> to vector<8x38xf32>
    %90 = vector.extract_strided_slice %22 {offsets = [16, 3], sizes = [8, 38], strides = [1, 1]} : vector<24x44xf32> to vector<8x38xf32>
    %91 = vector.extract_strided_slice %22 {offsets = [16, 4], sizes = [8, 38], strides = [1, 1]} : vector<24x44xf32> to vector<8x38xf32>
    %92 = vector.extract_strided_slice %22 {offsets = [16, 5], sizes = [8, 38], strides = [1, 1]} : vector<24x44xf32> to vector<8x38xf32>
    %93 = vector.extract_strided_slice %22 {offsets = [16, 6], sizes = [8, 38], strides = [1, 1]} : vector<24x44xf32> to vector<8x38xf32>
    %94 = tpu.concatenate %87, %88, %89, %90, %91, %92, %93 in 0 : vector<8x38xf32>, vector<8x38xf32>, vector<8x38xf32>, vector<8x38xf32>, vector<8x38xf32>, vector<8x38xf32>, vector<8x38xf32> -> vector<56x38xf32>
    %c0_59 = arith.constant 0 : index
    %c0_60 = arith.constant 0 : index
    %95 = vector.load %arg4[%c0_59, %c0_60] : memref<8x56xf32, #tpu.memory_space<vmem>>, vector<8x56xf32>
    %cst_61 = arith.constant dense<0.000000e+00> : vector<8x38xf32>
    %96 = tpu.matmul %95, %94, %cst_61 {dimension_numbers = #tpu.dot_dimension_numbers<[1], [0], [0], [1], [0, 0, 1, 1], [], []>} : vector<8x56xf32>, vector<56x38xf32>, vector<8x38xf32> -> vector<8x38xf32>
    %97 = vector.broadcast %47 : vector<8x1xf32> to vector<8x38xf32>
    %98 = arith.addf %96, %97 : vector<8x38xf32>
    %cst_62 = arith.constant 0.000000e+00 : f32
    %99 = vector.broadcast %cst_62 : f32 to vector<8x38xf32>
    %100 = arith.maximumf %98, %99 : vector<8x38xf32>
    %101 = vector.extract_strided_slice %46 {offsets = [16, 0], sizes = [8, 38], strides = [1, 1]} : vector<24x38xf32> to vector<8x38xf32>
    %102 = arith.addf %101, %100 : vector<8x38xf32>
    %103 = vector.broadcast %38 : vector<1x38xf32> to vector<8x38xf32>
    %104 = arith.mulf %102, %103 : vector<8x38xf32>
    %c24 = arith.constant 24 : index
    %c3_63 = arith.constant 3 : index
    %105 = vector.load %arg10[%c24, %c3_63] : memref<40x44xf32, #tpu.memory_space<vmem>>, vector<8x38xf32>
    tpu.vector_store %arg10[%c24, %c3_63], %104 {strides = array<i32>} : memref<40x44xf32, #tpu.memory_space<vmem>>, vector<8x38xf32>,
    %c0_64 = arith.constant 0 : index
    %c0_65 = arith.constant 0 : index
    %106 = vector.load %arg10[%c0_64, %c0_65] : memref<40x44xf32, #tpu.memory_space<vmem>>, vector<40x44xf32>
    %c0_66 = arith.constant 0 : index
    %c0_67 = arith.constant 0 : index
    %c0_68 = arith.constant 0 : index
    %c0_69 = arith.constant 0 : index
    %107 = vector.load %arg1[%c0_66, %c0_67, %c0_68, %c0_69] : memref<2x8x3x16xf32, #tpu.memory_space<vmem>>, vector<2x8x3x16xf32>
    %c0_70 = arith.constant 0 : index
    %c0_71 = arith.constant 0 : index
    %c0_72 = arith.constant 0 : index
    %c0_73 = arith.constant 0 : index
    %108 = vector.load %arg8[%c0_70, %c0_71, %c0_72, %c0_73] : memref<2x16x3x16xf32, #tpu.memory_space<vmem>>, vector<2x8x3x16xf32>
    tpu.vector_store %arg8[%c0_70, %c0_71, %c0_72, %c0_73], %107 {strides = array<i32>} : memref<2x16x3x16xf32, #tpu.memory_space<vmem>>, vector<2x8x3x16xf32>,
    %109 = vector.extract_strided_slice %106 {offsets = [0, 2], sizes = [8, 38], strides = [1, 1]} : vector<40x44xf32> to vector<8x38xf32>
    %110 = vector.extract_strided_slice %106 {offsets = [0, 3], sizes = [8, 38], strides = [1, 1]} : vector<40x44xf32> to vector<8x38xf32>
    %111 = vector.extract_strided_slice %106 {offsets = [0, 4], sizes = [8, 38], strides = [1, 1]} : vector<40x44xf32> to vector<8x38xf32>
    %112 = vector.extract_strided_slice %106 {offsets = [8, 2], sizes = [8, 38], strides = [1, 1]} : vector<40x44xf32> to vector<8x38xf32>
    %113 = vector.extract_strided_slice %106 {offsets = [8, 3], sizes = [8, 38], strides = [1, 1]} : vector<40x44xf32> to vector<8x38xf32>
    %114 = vector.extract_strided_slice %106 {offsets = [8, 4], sizes = [8, 38], strides = [1, 1]} : vector<40x44xf32> to vector<8x38xf32>
    %115 = vector.extract_strided_slice %106 {offsets = [16, 2], sizes = [8, 38], strides = [1, 1]} : vector<40x44xf32> to vector<8x38xf32>
    %116 = vector.extract_strided_slice %106 {offsets = [16, 3], sizes = [8, 38], strides = [1, 1]} : vector<40x44xf32> to vector<8x38xf32>
    %117 = vector.extract_strided_slice %106 {offsets = [16, 4], sizes = [8, 38], strides = [1, 1]} : vector<40x44xf32> to vector<8x38xf32>
    %118 = tpu.concatenate %109, %110, %111, %112, %113, %114, %115, %116, %117 in 0 : vector<8x38xf32>, vector<8x38xf32>, vector<8x38xf32>, vector<8x38xf32>, vector<8x38xf32>, vector<8x38xf32>, vector<8x38xf32>, vector<8x38xf32>, vector<8x38xf32> -> vector<72x38xf32>
    %c0_74 = arith.constant 0 : index
    %c0_75 = arith.constant 0 : index
    %119 = vector.load %arg6[%c0_74, %c0_75] : memref<8x72xf32, #tpu.memory_space<vmem>>, vector<8x72xf32>
    %cst_76 = arith.constant dense<0.000000e+00> : vector<8x38xf32>
    %120 = tpu.matmul %119, %118, %cst_76 {dimension_numbers = #tpu.dot_dimension_numbers<[1], [0], [0], [1], [0, 0, 1, 1], [], []>} : vector<8x72xf32>, vector<72x38xf32>, vector<8x38xf32> -> vector<8x38xf32>
    %121 = vector.broadcast %48 : vector<8x1xf32> to vector<8x38xf32>
    %122 = arith.addf %120, %121 : vector<8x38xf32>
    %123 = vector.extract_strided_slice %122 {offsets = [0, 0], sizes = [8, 16], strides = [1, 1]} : vector<8x38xf32> to vector<8x16xf32>
    %c0_77 = arith.constant 0 : index
    %c8_78 = arith.constant 8 : index
    %c0_79 = arith.constant 0 : index
    %c0_80 = arith.constant 0 : index
    %124 = vector.load %arg8[%c0_77, %c8_78, %c0_79, %c0_80] : memref<2x16x3x16xf32, #tpu.memory_space<vmem>>, vector<1x8x1x16xf32>
    %125 = vector.shape_cast %124 : vector<1x8x1x16xf32> to vector<8x16xf32>
    %126 = vector.shape_cast %123 : vector<8x16xf32> to vector<1x8x1x16xf32>
    tpu.vector_store %arg8[%c0_77, %c8_78, %c0_79, %c0_80], %126 {strides = array<i32>} : memref<2x16x3x16xf32, #tpu.memory_space<vmem>>, vector<1x8x1x16xf32>,
    %127 = vector.extract_strided_slice %122 {offsets = [0, 22], sizes = [8, 16], strides = [1, 1]} : vector<8x38xf32> to vector<8x16xf32>
    %c1_81 = arith.constant 1 : index
    %c8_82 = arith.constant 8 : index
    %c0_83 = arith.constant 0 : index
    %c0_84 = arith.constant 0 : index
    %128 = vector.load %arg8[%c1_81, %c8_82, %c0_83, %c0_84] : memref<2x16x3x16xf32, #tpu.memory_space<vmem>>, vector<1x8x1x16xf32>
    %129 = vector.shape_cast %128 : vector<1x8x1x16xf32> to vector<8x16xf32>
    %130 = vector.shape_cast %127 : vector<8x16xf32> to vector<1x8x1x16xf32>
    tpu.vector_store %arg8[%c1_81, %c8_82, %c0_83, %c0_84], %130 {strides = array<i32>} : memref<2x16x3x16xf32, #tpu.memory_space<vmem>>, vector<1x8x1x16xf32>,
    %131 = vector.extract_strided_slice %106 {offsets = [8, 2], sizes = [8, 38], strides = [1, 1]} : vector<40x44xf32> to vector<8x38xf32>
    %132 = vector.extract_strided_slice %106 {offsets = [8, 3], sizes = [8, 38], strides = [1, 1]} : vector<40x44xf32> to vector<8x38xf32>
    %133 = vector.extract_strided_slice %106 {offsets = [8, 4], sizes = [8, 38], strides = [1, 1]} : vector<40x44xf32> to vector<8x38xf32>
    %134 = vector.extract_strided_slice %106 {offsets = [16, 2], sizes = [8, 38], strides = [1, 1]} : vector<40x44xf32> to vector<8x38xf32>
    %135 = vector.extract_strided_slice %106 {offsets = [16, 3], sizes = [8, 38], strides = [1, 1]} : vector<40x44xf32> to vector<8x38xf32>
    %136 = vector.extract_strided_slice %106 {offsets = [16, 4], sizes = [8, 38], strides = [1, 1]} : vector<40x44xf32> to vector<8x38xf32>
    %137 = vector.extract_strided_slice %106 {offsets = [24, 2], sizes = [8, 38], strides = [1, 1]} : vector<40x44xf32> to vector<8x38xf32>
    %138 = vector.extract_strided_slice %106 {offsets = [24, 3], sizes = [8, 38], strides = [1, 1]} : vector<40x44xf32> to vector<8x38xf32>
    %139 = vector.extract_strided_slice %106 {offsets = [24, 4], sizes = [8, 38], strides = [1, 1]} : vector<40x44xf32> to vector<8x38xf32>
    %140 = tpu.concatenate %131, %132, %133, %134, %135, %136, %137, %138, %139 in 0 : vector<8x38xf32>, vector<8x38xf32>, vector<8x38xf32>, vector<8x38xf32>, vector<8x38xf32>, vector<8x38xf32>, vector<8x38xf32>, vector<8x38xf32>, vector<8x38xf32> -> vector<72x38xf32>
    %c0_85 = arith.constant 0 : index
    %c0_86 = arith.constant 0 : index
    %141 = vector.load %arg6[%c0_85, %c0_86] : memref<8x72xf32, #tpu.memory_space<vmem>>, vector<8x72xf32>
    %cst_87 = arith.constant dense<0.000000e+00> : vector<8x38xf32>
    %142 = tpu.matmul %141, %140, %cst_87 {dimension_numbers = #tpu.dot_dimension_numbers<[1], [0], [0], [1], [0, 0, 1, 1], [], []>} : vector<8x72xf32>, vector<72x38xf32>, vector<8x38xf32> -> vector<8x38xf32>
    %143 = vector.broadcast %48 : vector<8x1xf32> to vector<8x38xf32>
    %144 = arith.addf %142, %143 : vector<8x38xf32>
    %145 = vector.extract_strided_slice %144 {offsets = [0, 0], sizes = [8, 16], strides = [1, 1]} : vector<8x38xf32> to vector<8x16xf32>
    %c0_88 = arith.constant 0 : index
    %c8_89 = arith.constant 8 : index
    %c1_90 = arith.constant 1 : index
    %c0_91 = arith.constant 0 : index
    %146 = vector.load %arg8[%c0_88, %c8_89, %c1_90, %c0_91] : memref<2x16x3x16xf32, #tpu.memory_space<vmem>>, vector<1x8x1x16xf32>
    %147 = vector.shape_cast %146 : vector<1x8x1x16xf32> to vector<8x16xf32>
    %148 = vector.shape_cast %145 : vector<8x16xf32> to vector<1x8x1x16xf32>
    tpu.vector_store %arg8[%c0_88, %c8_89, %c1_90, %c0_91], %148 {strides = array<i32>} : memref<2x16x3x16xf32, #tpu.memory_space<vmem>>, vector<1x8x1x16xf32>,
    %149 = vector.extract_strided_slice %144 {offsets = [0, 22], sizes = [8, 16], strides = [1, 1]} : vector<8x38xf32> to vector<8x16xf32>
    %c1_92 = arith.constant 1 : index
    %c8_93 = arith.constant 8 : index
    %c1_94 = arith.constant 1 : index
    %c0_95 = arith.constant 0 : index
    %150 = vector.load %arg8[%c1_92, %c8_93, %c1_94, %c0_95] : memref<2x16x3x16xf32, #tpu.memory_space<vmem>>, vector<1x8x1x16xf32>
    %151 = vector.shape_cast %150 : vector<1x8x1x16xf32> to vector<8x16xf32>
    %152 = vector.shape_cast %149 : vector<8x16xf32> to vector<1x8x1x16xf32>
    tpu.vector_store %arg8[%c1_92, %c8_93, %c1_94, %c0_95], %152 {strides = array<i32>} : memref<2x16x3x16xf32, #tpu.memory_space<vmem>>, vector<1x8x1x16xf32>,
    %153 = vector.extract_strided_slice %106 {offsets = [16, 2], sizes = [8, 38], strides = [1, 1]} : vector<40x44xf32> to vector<8x38xf32>
    %154 = vector.extract_strided_slice %106 {offsets = [16, 3], sizes = [8, 38], strides = [1, 1]} : vector<40x44xf32> to vector<8x38xf32>
    %155 = vector.extract_strided_slice %106 {offsets = [16, 4], sizes = [8, 38], strides = [1, 1]} : vector<40x44xf32> to vector<8x38xf32>
    %156 = vector.extract_strided_slice %106 {offsets = [24, 2], sizes = [8, 38], strides = [1, 1]} : vector<40x44xf32> to vector<8x38xf32>
    %157 = vector.extract_strided_slice %106 {offsets = [24, 3], sizes = [8, 38], strides = [1, 1]} : vector<40x44xf32> to vector<8x38xf32>
    %158 = vector.extract_strided_slice %106 {offsets = [24, 4], sizes = [8, 38], strides = [1, 1]} : vector<40x44xf32> to vector<8x38xf32>
    %159 = vector.extract_strided_slice %106 {offsets = [32, 2], sizes = [8, 38], strides = [1, 1]} : vector<40x44xf32> to vector<8x38xf32>
    %160 = vector.extract_strided_slice %106 {offsets = [32, 3], sizes = [8, 38], strides = [1, 1]} : vector<40x44xf32> to vector<8x38xf32>
    %161 = vector.extract_strided_slice %106 {offsets = [32, 4], sizes = [8, 38], strides = [1, 1]} : vector<40x44xf32> to vector<8x38xf32>
    %162 = tpu.concatenate %153, %154, %155, %156, %157, %158, %159, %160, %161 in 0 : vector<8x38xf32>, vector<8x38xf32>, vector<8x38xf32>, vector<8x38xf32>, vector<8x38xf32>, vector<8x38xf32>, vector<8x38xf32>, vector<8x38xf32>, vector<8x38xf32> -> vector<72x38xf32>
    %c0_96 = arith.constant 0 : index
    %c0_97 = arith.constant 0 : index
    %163 = vector.load %arg6[%c0_96, %c0_97] : memref<8x72xf32, #tpu.memory_space<vmem>>, vector<8x72xf32>
    %cst_98 = arith.constant dense<0.000000e+00> : vector<8x38xf32>
    %164 = tpu.matmul %163, %162, %cst_98 {dimension_numbers = #tpu.dot_dimension_numbers<[1], [0], [0], [1], [0, 0, 1, 1], [], []>} : vector<8x72xf32>, vector<72x38xf32>, vector<8x38xf32> -> vector<8x38xf32>
    %165 = vector.broadcast %48 : vector<8x1xf32> to vector<8x38xf32>
    %166 = arith.addf %164, %165 : vector<8x38xf32>
    %167 = vector.extract_strided_slice %166 {offsets = [0, 0], sizes = [8, 16], strides = [1, 1]} : vector<8x38xf32> to vector<8x16xf32>
    %c0_99 = arith.constant 0 : index
    %c8_100 = arith.constant 8 : index
    %c2_101 = arith.constant 2 : index
    %c0_102 = arith.constant 0 : index
    %168 = vector.load %arg8[%c0_99, %c8_100, %c2_101, %c0_102] : memref<2x16x3x16xf32, #tpu.memory_space<vmem>>, vector<1x8x1x16xf32>
    %169 = vector.shape_cast %168 : vector<1x8x1x16xf32> to vector<8x16xf32>
    %170 = vector.shape_cast %167 : vector<8x16xf32> to vector<1x8x1x16xf32>
    tpu.vector_store %arg8[%c0_99, %c8_100, %c2_101, %c0_102], %170 {strides = array<i32>} : memref<2x16x3x16xf32, #tpu.memory_space<vmem>>, vector<1x8x1x16xf32>,
    %171 = vector.extract_strided_slice %166 {offsets = [0, 22], sizes = [8, 16], strides = [1, 1]} : vector<8x38xf32> to vector<8x16xf32>
    %c1_103 = arith.constant 1 : index
    %c8_104 = arith.constant 8 : index
    %c2_105 = arith.constant 2 : index
    %c0_106 = arith.constant 0 : index
    %172 = vector.load %arg8[%c1_103, %c8_104, %c2_105, %c0_106] : memref<2x16x3x16xf32, #tpu.memory_space<vmem>>, vector<1x8x1x16xf32>
    %173 = vector.shape_cast %172 : vector<1x8x1x16xf32> to vector<8x16xf32>
    %174 = vector.shape_cast %171 : vector<8x16xf32> to vector<1x8x1x16xf32>
    tpu.vector_store %arg8[%c1_103, %c8_104, %c2_105, %c0_106], %174 {strides = array<i32>} : memref<2x16x3x16xf32, #tpu.memory_space<vmem>>, vector<1x8x1x16xf32>,
    return
  }
  func.func @transform_0(%arg0: i32) -> (i32, i32, i32, i32) {
    %c0_i32 = arith.constant 0 : i32
    %c0_i32_0 = arith.constant 0 : i32
    %c0_i32_1 = arith.constant 0 : i32
    %c0_i32_2 = arith.constant 0 : i32
    return %arg0, %c0_i32, %c0_i32_0, %c0_i32_1 : i32, i32, i32, i32
  }
  func.func @transform_1(%arg0: i32) -> (i32, i32) {
    %c0_i32 = arith.constant 0 : i32
    %c0_i32_0 = arith.constant 0 : i32
    %c0_i32_1 = arith.constant 0 : i32
    return %c0_i32, %c0_i32_0 : i32, i32
  }
  func.func @transform_2(%arg0: i32) -> (i32, i32) {
    %c0_i32 = arith.constant 0 : i32
    %c0_i32_0 = arith.constant 0 : i32
    %c0_i32_1 = arith.constant 0 : i32
    return %c0_i32, %c0_i32_0 : i32, i32
  }
  func.func @transform_3(%arg0: i32) -> (i32, i32) {
    %c0_i32 = arith.constant 0 : i32
    %c0_i32_0 = arith.constant 0 : i32
    %c0_i32_1 = arith.constant 0 : i32
    return %c0_i32, %c0_i32_0 : i32, i32
  }
  func.func @transform_4(%arg0: i32) -> (i32, i32) {
    %c0_i32 = arith.constant 0 : i32
    %c0_i32_0 = arith.constant 0 : i32
    %c0_i32_1 = arith.constant 0 : i32
    return %c0_i32, %c0_i32_0 : i32, i32
  }
  func.func @transform_5(%arg0: i32) -> (i32, i32) {
    %c0_i32 = arith.constant 0 : i32
    %c0_i32_0 = arith.constant 0 : i32
    %c0_i32_1 = arith.constant 0 : i32
    return %c0_i32, %c0_i32_0 : i32, i32
  }
  func.func @transform_6(%arg0: i32) -> (i32, i32) {
    %c0_i32 = arith.constant 0 : i32
    %c0_i32_0 = arith.constant 0 : i32
    %c0_i32_1 = arith.constant 0 : i32
    return %c0_i32, %c0_i32_0 : i32, i32
  }
  func.func @transform_7(%arg0: i32) -> (i32, i32, i32, i32) {
    %c0_i32 = arith.constant 0 : i32
    %c0_i32_0 = arith.constant 0 : i32
    %c0_i32_1 = arith.constant 0 : i32
    %c0_i32_2 = arith.constant 0 : i32
    return %arg0, %c0_i32, %c0_i32_0, %c0_i32_1 : i32, i32, i32, i32
  }
}

</mosaic_0001>

<bundles_post_ra>
// kernel: tpu_custom_call.1
= control target key start
LH: loop header
LB: loop body
LE: loop exit
PB: predicated region body
PF: predicated region fallthrough
CT: control target
= control target key end

     0   :  { %vm52_vm0 = vcmask 1041409   ;;  %vm55_vm1 = vcmask 1042434   ;;  %vm58_vm2 = vcmask 1043459   ;;  %vm61_vm3 = vcmask 1044484   ;;  %s1700_s26 = smov 3   ;;  %s1701_s14 = smov 25   ;;  %s2532_s0 = inlined_call_operand.vmem [shape: f32[2,8,3,16], index: 0, kind: input, shape index: {}]   ;;  %s2533_s2 = inlined_call_operand.vmem [shape: f32[24,1], index: 2, kind: input, shape index: {}]   ;;  %s2534_s4 = inlined_call_operand.vmem [shape: f32[8,1], index: 4, kind: input, shape index: {}]   ;;  %s2535_s1 = inlined_call_operand.vmem [shape: f32[24,24], index: 1, kind: input, shape index: {}]   ;;  %s2536_s3 = inlined_call_operand.vmem [shape: f32[8,56], index: 3, kind: input, shape index: {}]   ;;  %s2537_s6 = inlined_call_operand.vmem [shape: f32[8,1], index: 6, kind: input, shape index: {}]   ;;  %s2538_s7 = inlined_call_operand.vmem [shape: f32[2,16,3,16], index: 7, kind: output, shape index: {}]   ;;  %s2539_s5 = inlined_call_operand.vmem [shape: f32[8,72], index: 5, kind: input, shape index: {}]  }
   0x1   :  { %vm64_vm4 = vcmask 1045509   ;;  %vm67_vm5 = vcmask 1046534   ;;  %v181_v0 = vld [vmem:[%s2532_s0 + $0x2] sm:$0x1]  ;;  %vm26_vm6 = vcmask 359424   ;;  %v1699_v20 = vmov 0.0  }
   0x2   :  { %v182_v1 = vld [vmem:[%s2532_s0 + $0x6] sm:$0x1]  ;;  %v183_v2 = vld [vmem:[%s2532_s0 + $0xa] sm:$0x1]  ;;  %v184_v3 = vld [vmem:[%s2532_s0 + $0xe] sm:$0x1]  ;;  %1555 = vmatprep.subr.mxu1 %v1699_v20  ;;  %1587 = vmatprep.subr.mxu0 %v1699_v20 }
   0x3   :  { %v185_v4 = vld [vmem:[%s2532_s0 + $0x12] sm:$0x1]  ;;  %v186_v5 = vld [vmem:[%s2532_s0 + $0x16] sm:$0x1]  ;;  %v187_v6 = vld [vmem:[%s2532_s0 + $0x1a] sm:$0x1] }
   0x4   :  { %v188_v7 = vld [vmem:[%s2532_s0 + $0x1e] sm:$0x1]  ;;  %v197_v8 = vrot.slane %v182_v1, 7  ;;  %v199_v9 = vrot.slane %v183_v2, 6  ;;  %v201_v10 = vrot.slane %v184_v3, 5  ;;  %v203_v11 = vrot.slane %v185_v4, 4 }
   0x5   :  { %v205_v12 = vrot.slane %v186_v5, 3  ;;  %v207_v13 = vrot.slane %v187_v6, 2  ;;  %v209_v14 = vrot.slane %v188_v7, 1  ;;  %v113_v15 = vld [vmem:[%s2532_s0 + $0x1] sm:$0x1]  ;;  %29 = vst.msk [vmem:[#allocation2 + $0x10] sm:$0xff] %vm26_vm6, %v1699_v20 }
   0x6   :  { %v198_v16 = vsel %vm52_vm0, %v197_v8, %v181_v0  ;;  %v114_v17 = vld [vmem:[%s2532_s0 + $0x5] sm:$0x1]  ;;  %v115_v18 = vld [vmem:[%s2532_s0 + $0x9] sm:$0x1]  ;;  %v116_v19 = vld [vmem:[%s2532_s0 + $0xd] sm:$0x1] }
   0x7   :  { %27 = vst.msk [vmem:[#allocation2] sm:$0xff] %vm26_vm6, %v1699_v20  ;;  %28 = vst.msk [vmem:[#allocation2 + $0x8] sm:$0xff] %vm26_vm6, %v1699_v20  ;;  %v200_v21 = vsel %vm55_vm1, %v199_v9, %v198_v16  ;;  %v117_v22 = vld [vmem:[%s2532_s0 + $0x11] sm:$0x1]  ;;  %v118_v23 = vld [vmem:[%s2532_s0 + $0x15] sm:$0x1] }
   0x8   :  { %30 = vst.msk [vmem:[#allocation3] sm:$0xff] %vm26_vm6, %v1699_v20  ;;  %31 = vst.msk [vmem:[#allocation3 + $0x8] sm:$0xff] %vm26_vm6, %v1699_v20  ;;  %v119_v24 = vld [vmem:[%s2532_s0 + $0x19] sm:$0x1]  ;;  %v202_v25 = vsel %vm58_vm2, %v201_v10, %v200_v21  ;;  %v120_v26 = vld [vmem:[%s2532_s0 + $0x1d] sm:$0x1] }
   0x9   :  { %32 = vst.msk [vmem:[#allocation3 + $0x10] sm:$0xff] %vm26_vm6, %v1699_v20  ;;  %33 = vst.msk [vmem:[#allocation3 + $0x18] sm:$0xff] %vm26_vm6, %v1699_v20  ;;  %v129_v27 = vrot.slane %v114_v17, 7  ;;  %v131_v28 = vrot.slane %v115_v18, 6  ;;  %v133_v29 = vrot.slane %v116_v19, 5  ;;  %vm70_vm7 = vcmask 1047559  }
   0xa   :  { %34 = vst.msk [vmem:[#allocation3 + $0x20] sm:$0xff] %vm26_vm6, %v1699_v20  ;;  %v204_v30 = vsel %vm61_vm3, %v203_v11, %v202_v25  ;;  %v135_v31 = vrot.slane %v117_v22, 4  ;;  %v137_v32 = vrot.slane %v118_v23, 3  ;;  %v1429_v33 = vld [vmem:[%s2532_s0 + $0x22] sm:$0x1]  ;;  %v139_v36 = vrot.slane %v119_v24, 2 }
   0xb   :  { %v206_v34 = vsel %vm64_vm4, %v205_v12, %v204_v30  ;;  %v130_v35 = vsel %vm52_vm0, %v129_v27, %v113_v15  ;;  %v141_v37 = vrot.slane %v120_v26, 1  ;;  %v1430_v38 = vld [vmem:[%s2532_s0 + $0x26] sm:$0x1]  ;;  %v1431_v39 = vld [vmem:[%s2532_s0 + $0x2a] sm:$0x1]  ;;  %vm75_vm8 = vcmask 154648  }
   0xc   :  { %v208_v40 = vsel %vm67_vm5, %v207_v13, %v206_v34  ;;  %v132_v41 = vsel %vm55_vm1, %v131_v28, %v130_v35  ;;  %v1432_v42 = vld [vmem:[%s2532_s0 + $0x2e] sm:$0x1]  ;;  %v1433_v43 = vld [vmem:[%s2532_s0 + $0x32] sm:$0x1]  ;;  %v1434_v44 = vld [vmem:[%s2532_s0 + $0x36] sm:$0x1] }
   0xd   :  { %v210_v45 = vsel %vm70_vm7, %v209_v14, %v208_v40  ;;  %v134_v46 = vsel %vm58_vm2, %v133_v29, %v132_v41  ;;  %v1435_v47 = vld [vmem:[%s2532_s0 + $0x3a] sm:$0x1]  ;;  %v1436_v48 = vld [vmem:[%s2532_s0 + $0x3e] sm:$0x1]  ;;  %v231_v49 = vrot.slane %v1430_v38, 7  ;;  %v233_v50 = vrot.slane %v1431_v39, 6 }
   0xe   :  { %211 = vrot.lane.b32.xlu0 %v210_v45, %s1700_s26  ;;  %v136_v51 = vsel %vm61_vm3, %v135_v31, %v134_v46  ;;  %v235_v52 = vrot.slane %v1432_v42, 5  ;;  %v237_v53 = vrot.slane %v1433_v43, 4  ;;  %v239_v54 = vrot.slane %v1434_v44, 3  ;;  %v1421_v55 = vld [vmem:[%s2532_s0 + $0x21] sm:$0x1]  ;;  %s1702_s9 = smov 125  }
   0xf   :  { %v138_v56 = vsel %vm64_vm4, %v137_v32, %v136_v51  ;;  %v232_v57 = vsel %vm52_vm0, %v231_v49, %v1429_v33  ;;  %v241_v58 = vrot.slane %v1435_v47, 2  ;;  %v243_v59 = vrot.slane %v1436_v48, 1  ;;  %v1422_v60 = vld [vmem:[%s2532_s0 + $0x25] sm:$0x1]  ;;  %v1423_v61 = vld [vmem:[%s2532_s0 + $0x29] sm:$0x1] }
  0x10   :  { %v140_v62 = vsel %vm67_vm5, %v139_v36, %v138_v56  ;;  %v234_v63 = vsel %vm55_vm1, %v233_v50, %v232_v57  ;;  %v1424_v0 = vld [vmem:[%s2532_s0 + $0x2d] sm:$0x1]  ;;  %v1425_v1 = vld [vmem:[%s2532_s0 + $0x31] sm:$0x1]  ;;  %v1426_v2 = vld [vmem:[%s2532_s0 + $0x35] sm:$0x1] }
  0x11   :  { %v142_v3 = vsel %vm70_vm7, %v141_v37, %v140_v62  ;;  %v236_v4 = vsel %vm58_vm2, %v235_v52, %v234_v63  ;;  %v1427_v5 = vld [vmem:[%s2532_s0 + $0x39] sm:$0x1]  ;;  %v1428_v6 = vld [vmem:[%s2532_s0 + $0x3d] sm:$0x1]  ;;  %v163_v7 = vrot.slane %v1422_v60, 7  ;;  %v165_v8 = vrot.slane %v1423_v61, 6 }
  0x12   :  { %143 = vrot.lane.b32.xlu1 %v142_v3, %s1700_s26  ;;  %v238_v9 = vsel %vm61_vm3, %v237_v53, %v236_v4  ;;  %v167_v10 = vrot.slane %v1424_v0, 5  ;;  %v169_v11 = vrot.slane %v1425_v1, 4  ;;  %v171_v12 = vrot.slane %v1426_v2, 3  ;;  %v35_v13 = vld [vmem:[%s2532_s0] sm:$0x1]  ;;  %s1704_s10 = smov 122  }
  0x13   :  { %v240_v14 = vsel %vm64_vm4, %v239_v54, %v238_v9  ;;  %v164_v15 = vsel %vm52_vm0, %v163_v7, %v1421_v55  ;;  %v173_v16 = vrot.slane %v1427_v5, 2  ;;  %v175_v17 = vrot.slane %v1428_v6, 1  ;;  %v36_v18 = vld [vmem:[%s2532_s0 + $0x4] sm:$0x1]  ;;  %v37_v19 = vld [vmem:[%s2532_s0 + $0x8] sm:$0x1] }
  0x14   :  { %v242_v21 = vsel %vm67_vm5, %v241_v58, %v240_v14  ;;  %v166_v22 = vsel %vm55_vm1, %v165_v8, %v164_v15  ;;  %v38_v23 = vld [vmem:[%s2532_s0 + $0xc] sm:$0x1]  ;;  %v39_v24 = vld [vmem:[%s2532_s0 + $0x10] sm:$0x1]  ;;  %v40_v25 = vld [vmem:[%s2532_s0 + $0x14] sm:$0x1] }
  0x15   :  { %v244_v26 = vsel %vm70_vm7, %v243_v59, %v242_v21  ;;  %v168_v27 = vsel %vm58_vm2, %v167_v10, %v166_v22  ;;  %v41_v28 = vld [vmem:[%s2532_s0 + $0x18] sm:$0x1]  ;;  %v42_v29 = vld [vmem:[%s2532_s0 + $0x1c] sm:$0x1]  ;;  %v51_v30 = vrot.slane %v36_v18, 7  ;;  %v54_v31 = vrot.slane %v37_v19, 6 }
  0x16   :  { %245 = vrot.lane.b32.xlu0 %v244_v26, %s1701_s14  ;;  %v170_v32 = vsel %vm61_vm3, %v169_v11, %v168_v27  ;;  %v57_v33 = vrot.slane %v38_v23, 5  ;;  %v60_v34 = vrot.slane %v39_v24, 4  ;;  %v63_v35 = vrot.slane %v40_v25, 3  ;;  %v1413_v36 = vld [vmem:[%s2532_s0 + $0x20] sm:$0x1]  ;;  %s1705_s11 = smov 123  }
  0x17   :  { %v172_v37 = vsel %vm64_vm4, %v171_v12, %v170_v32  ;;  %v53_v38 = vsel %vm52_vm0, %v51_v30, %v35_v13  ;;  %v66_v39 = vrot.slane %v41_v28, 2  ;;  %v69_v40 = vrot.slane %v42_v29, 1  ;;  %v1414_v41 = vld [vmem:[%s2532_s0 + $0x24] sm:$0x1]  ;;  %v1415_v42 = vld [vmem:[%s2532_s0 + $0x28] sm:$0x1] }
  0x18   :  { %v174_v43 = vsel %vm67_vm5, %v173_v16, %v172_v37  ;;  %v56_v44 = vsel %vm55_vm1, %v54_v31, %v53_v38  ;;  %v1416_v45 = vld [vmem:[%s2532_s0 + $0x2c] sm:$0x1]  ;;  %v1417_v46 = vld [vmem:[%s2532_s0 + $0x30] sm:$0x1]  ;;  %v1418_v47 = vld [vmem:[%s2532_s0 + $0x34] sm:$0x1] }
  0x19   :  { %v176_v48 = vsel %vm70_vm7, %v175_v17, %v174_v43  ;;  %v59_v49 = vsel %vm58_vm2, %v57_v33, %v56_v44  ;;  %v1419_v50 = vld [vmem:[%s2532_s0 + $0x38] sm:$0x1]  ;;  %v94_v51 = vrot.slane %v1414_v41, 7  ;;  %v96_v52 = vrot.slane %v1415_v42, 6  ;;  %v1420_v54 = vld [vmem:[%s2532_s0 + $0x3c] sm:$0x1] }
  0x1a   :  { %177 = vrot.lane.b32.xlu1 %v176_v48, %s1701_s14  ;;  %v62_v53 = vsel %vm61_vm3, %v60_v34, %v59_v49  ;;  %v98_v55 = vrot.slane %v1416_v45, 5  ;;  %v100_v56 = vrot.slane %v1417_v46, 4  ;;  %v102_v59 = vrot.slane %v1418_v47, 3  ;;  %s1706_s12 = smov 124   ;;  %s1707_s13 = smov 127   ;;  %v268_v16 = vld [vmem:[%s2533_s2 + $0x8] sm:$0xff] }
  0x1b   :  { %v65_v57 = vsel %vm64_vm4, %v63_v35, %v62_v53  ;;  %v95_v58 = vsel %vm52_vm0, %v94_v51, %v1413_v36  ;;  %v104_v62 = vrot.slane %v1419_v50, 2  ;;  %v106_v1 = vrot.slane %v1420_v54, 1  ;;  %v269_v17 = vld [vmem:[%s2533_s2 + $0x10] sm:$0xff]  ;;  %v390_v18 = vld [vmem:[%s2534_s4] sm:$0xff]  ;;  %v265_v28 = vld [vmem:[%s2535_s1 + $0x8] sm:$0xff]  ;;  %s1711_s20 = smov 106  }
  0x1c   :  { %v68_v60 = vsel %vm67_vm5, %v66_v39, %v65_v57  ;;  %v97_v61 = vsel %vm55_vm1, %v96_v52, %v95_v58  ;;  %vm111_vm9 = vcmask 335048   ;;  %vm1703_vm10 = vmmov 0   ;;  %v267_v19 = vld [vmem:[%s2533_s2] sm:$0xff]  ;;  %v266_v31 = vld [vmem:[%s2535_s1 + $0x10] sm:$0xff] }
  0x1d   :  { %v71_v63 = vsel %vm70_vm7, %v69_v40, %v68_v60  ;;  %v99_v0 = vsel %vm58_vm2, %v98_v55, %v97_v61  ;;  %1561 = vmatprep.mubr.msk.f32.mxu1 %vm1703_vm10, %v1699_v20  ;;  %1601 = vmatprep.mubr.msk.f32.mxu0 %vm1703_vm10, %v1699_v20  ;;  %v1709_v15 = vmov 0   ;;  %v264_v25 = vld [vmem:[%s2535_s1] sm:$0xff]  ;;  %vm297_vm11 = vcmask 195584  }
  0x1e   :  { %72 = vrot.lane.b32.xlu0 %v71_v63, %s1700_s26  ;;  %v101_v2 = vsel %vm61_vm3, %v100_v56, %v99_v0  ;;  %1698 = vset.pattern.permute.xlu1 %v1709_v15  ;;  %v407_v35 = vld [vmem:[%s2536_s3] sm:$0xff]  ;;  %vm413_vm12 = vcmask 457728   ;;  %v252_v43 = vlaneseq  ;;  %vm494_vm2 = vcmask 334872  }
  0x1f   :  { %v103_v3 = vsel %vm64_vm4, %v102_v59, %v101_v2  ;;  %1697 = vset.pattern.permute.xlu0 %v1709_v15  ;;  %vm711_vm3 = vcmask 124928   ;;  %vm770_vm4 = vcmask 588800  }
  0x20   :  { %v105_v4 = vsel %vm67_vm5, %v104_v62, %v103_v3  ;;  %v253_v46 = vand.u32 127, %v252_v43  ;;  %vm903_vm5 = vcmask 122880  }
  0x21   :  { %v107_v5 = vsel %vm70_vm7, %v106_v1, %v105_v4 }
  0x22   :  { %108 = vrot.lane.b32.xlu1 %v107_v5, %s1701_s14  ;;  %s1708_s14 = smov 126   ;;  %v254_v49 = vadd.s32 3, %v253_v46  ;;  %v705_v46 = vld [vmem:[%s2532_s0 + $0x28] sm:$0x7] }
  0x23   :  { %722 = vst.msk [vmem:[%s2538_s7 + $0x48] sm:$0x7] %vm711_vm3, %v705_v46 }
  0x24   :  { %vm258_vm13 = vcmp.ge.s32.totalorder %v254_v49, 25  ;;  %vm259_vm14 = vcmp.lt.s32.totalorder %v254_v49, 41  ;;  %vm256_vm15 = vcmp.lt.s32.totalorder %v254_v49, 19  ;;  %v707_v49 = vld [vmem:[%s2532_s0 + $0x30] sm:$0x7] }
  0x25   :  { %vm260_vm0 = vmand %vm258_vm13, %vm259_vm14  ;;  %724 = vst.msk [vmem:[%s2538_s7 + $0x50] sm:$0x7] %vm711_vm3, %v707_v49 }
  0x26   :  { %vm261_vm1 = vmor %vm256_vm15, %vm260_vm0 }
  0x27   :  { %v1437_v63 = vsel %vm261_vm1, 1.0, %v1699_v20 }
  0x80   :  { %v212_v6 = vpop.permute.xlu0 %211 }
  0x81   :  { %214 = vst.msk [vmem:[#allocation2 + $0x10] sm:$0xff] %vm75_vm8, %v212_v6 }
  0x84   :  { %v144_v7 = vpop.permute.xlu1 %143 }
  0x85   :  { %146 = vst.msk [vmem:[#allocation2 + $0x8] sm:$0xff] %vm75_vm8, %v144_v7 }
  0x88   :  { %v246_v8 = vpop.permute.xlu0 %245 }
  0x89   :  { %248 = vst.msk [vmem:[#allocation2 + $0x10] sm:$0xff] %vm111_vm9, %v246_v8 }
  0x8c   :  { %v178_v9 = vpop.permute.xlu1 %177 }
  0x8d   :  { %180 = vst.msk [vmem:[#allocation2 + $0x8] sm:$0xff] %vm111_vm9, %v178_v9 }
  0x90   :  { %v73_v10 = vpop.permute.xlu0 %72  ;;  %v1962_v11 = vld [vmem:[#allocation2 + $0x10] sm:$0xff] }
  0x91   :  { %76 = vst.msk [vmem:[#allocation2] sm:$0xff] %vm75_vm8, %v73_v10  ;;  %292 = vrot.lane.b32.xlu0 %v1962_v11, %s1702_s9 }
  0x94   :  { %v109_v12 = vpop.permute.xlu1 %108  ;;  %v1969_v13 = vld [vmem:[#allocation2 + $0x8] sm:$0xff] }
  0x95   :  { %112 = vst.msk [vmem:[#allocation2] sm:$0xff] %vm111_vm9, %v109_v12  ;;  %290 = vrot.lane.b32.xlu1 %v1969_v13, %s1702_s9  ;;  %508 = vrot.lane.b32.xlu0 %v1969_v13, %s1704_s10 }
  0x99   :  { %505 = vrot.lane.b32.xlu0 %v1969_v13, %s1705_s11 }
  0x9c   :  { %v1974_v14 = vld [vmem:[#allocation2] sm:$0xff] }
  0x9d   :  { %288 = vrot.lane.b32.xlu1 %v1974_v14, %s1702_s9  ;;  %502 = vrot.lane.b32.xlu0 %v1969_v13, %s1706_s12 }
  0xa1   :  { %404 = vrot.lane.b32.xlu1 %v1974_v14, %s1704_s10  ;;  %398 = vrot.lane.b32.xlu0 %v1974_v14, %s1706_s12 }
  0xa5   :  { %401 = vrot.lane.b32.xlu1 %v1974_v14, %s1705_s11  ;;  %496 = vrot.lane.b32.xlu0 %v1969_v13, %s1707_s13 }
  0xa9   :  { %499 = vrot.lane.b32.xlu1 %v1969_v13, %s1708_s14  ;;  %392 = vrot.lane.b32.xlu0 %v1974_v14, %s1707_s13 }
  0xad   :  { %395 = vrot.lane.b32.xlu1 %v1974_v14, %s1708_s14  ;;  %602 = vrot.lane.b32.xlu0 %v1962_v11, %s1705_s11 }
  0xb1   :  { %605 = vrot.lane.b32.xlu1 %v1962_v11, %s1704_s10  ;;  %596 = vrot.lane.b32.xlu0 %v1962_v11, %s1708_s14 }
  0xb5   :  { %599 = vrot.lane.b32.xlu1 %v1962_v11, %s1706_s12  ;;  %277 = vperm.xlu0 %1697, %v268_v16  }
  0xb9   :  { %593 = vrot.lane.b32.xlu1 %v1962_v11, %s1707_s13  ;;  %282 = vperm.xlu0 %1697, %v269_v17  }
  0xbd   :  { %410 = vperm.xlu1 %1698, %v390_v18  }
  0xc1   :  { %272 = vperm.xlu1 %1698, %v267_v19  }
 0x103   :  { %v2008_v21 = vpop.permute.xlu0 %292 }
 0x104   :  { %1556 = vmatpush3.msra.mxu1 %v2008_v21 }
 0x105   :  { %1557 = vmatprep.subr.mxu1 %v1699_v20 }
 0x107   :  { %v291_v22 = vpop.permute.xlu1 %290  ;;  %v509_v23 = vpop.permute.xlu0 %508 }
 0x108   :  { %1558 = vmatpush3.msra.mxu1 %v291_v22  ;;  %1588 = vmatpush3.msra.mxu0 %v509_v23 }
 0x109   :  { %1559 = vmatprep.subr.mxu1 %v1699_v20  ;;  %1589 = vmatprep.subr.mxu0 %v1699_v20 }
 0x10b   :  { %v506_v24 = vpop.permute.xlu0 %505 }
 0x10c   :  { %1590 = vmatpush3.msra.mxu0 %v506_v24  ;;  %v694_v24 = vld [vmem:[#allocation3 + $0x20] sm:$0xff] }
 0x10d   :  { %1591 = vmatprep.subr.mxu0 %v1699_v20 }
 0x10f   :  { %v289_v26 = vpop.permute.xlu1 %288  ;;  %v503_v27 = vpop.permute.xlu0 %502 }
 0x110   :  { %1560 = vmatpush3.msra.mxu1 %v289_v26  ;;  %1592 = vmatpush3.msra.mxu0 %v503_v27 }
 0x111   :  { %1570 = vmatprep.subr.mxu1 %v1699_v20  ;;  %1562 = vmatmul.mubr.msk.f32.vlgmr.msra.gmra.mxu1 %vm297_vm11, %v264_v25 }
 0x112   :  { %1593 = vmatprep.subr.mxu0 %v1699_v20  ;;  %1564 = vmatprep.mubr.msk.f32.mxu1 %vm1703_vm10, %v1699_v20 }
 0x113   :  { %v405_v29 = vpop.permute.xlu1 %404  ;;  %1594 = vmatpush3.msra.mxu0 %v291_v22  ;;  %v399_v30 = vpop.permute.xlu0 %398  ;;  %v690_v22 = vld [vmem:[#allocation3] sm:$0xff] }
 0x114   :  { %1571 = vmatpush3.msra.mxu1 %v405_v29  ;;  %1595 = vmatprep.subr.mxu0 %v1699_v20 }
 0x115   :  { %1572 = vmatprep.subr.mxu1 %v1699_v20  ;;  %1565 = vmatmul.mubr.msk.f32.gmra.mxu1 %vm297_vm11, %v265_v28 }
 0x116   :  { %1567 = vmatprep.mubr.msk.f32.mxu1 %vm1703_vm10, %v1699_v20 }
 0x117   :  { %v402_v32 = vpop.permute.xlu1 %401  ;;  %v497_v33 = vpop.permute.xlu0 %496 }
 0x118   :  { %1573 = vmatpush3.msra.mxu1 %v402_v32 }
 0x119   :  { %1574 = vmatprep.subr.mxu1 %v1699_v20  ;;  %1568 = vmatmul.mubr.msk.f32.gmra.mxu1 %vm297_vm11, %v266_v31 }
 0x11a   :  { %1575 = vmatpush3.msra.mxu1 %v399_v30  ;;  %1584 = vmatprep.mubr.msk.f32.mxu1 %vm1703_vm10, %v1699_v20 }
 0x11b   :  { %v500_v34 = vpop.permute.xlu1 %499  ;;  %1576 = vmatprep.subr.mxu1 %v1699_v20  ;;  %v393_v37 = vpop.permute.xlu0 %392 }
 0x11c   :  { %1596 = vmatpush3.msra.mxu0 %v500_v34  ;;  %1577 = vmatpush3.msra.mxu1 %v289_v26 }
 0x11d   :  { %1597 = vmatprep.subr.mxu0 %v1699_v20  ;;  %1578 = vmatprep.subr.mxu1 %v1699_v20 }
 0x11e   :  { %1598 = vmatpush3.msra.mxu0 %v497_v33 }
 0x11f   :  { %v396_v36 = vpop.permute.xlu1 %395  ;;  %1599 = vmatprep.subr.mxu0 %v1699_v20  ;;  %v603_v39 = vpop.permute.xlu0 %602 }
 0x120   :  { %1579 = vmatpush3.msra.mxu1 %v396_v36  ;;  %1600 = vmatpush3.msra.mxu0 %v1969_v13  ;;  %v696_v36 = vld [vmem:[%s2532_s0 + $0x4] sm:$0x7] }
 0x121   :  { %1580 = vmatprep.subr.mxu1 %v1699_v20  ;;  %1602 = vmatmul.mubr.msk.f32.vlgmr.msra.gmra.mxu0 %vm413_vm12, %v407_v35  ;;  %713 = vst.msk [vmem:[%s2538_s7 + $0x4] sm:$0x7] %vm711_vm3, %v696_v36 }
 0x122   :  { %1581 = vmatpush3.msra.mxu1 %v393_v37  ;;  %1621 = vmatprep.subr.mxu0 %v1699_v20  ;;  %v697_v37 = vld [vmem:[%s2532_s0 + $0x8] sm:$0x7] }
 0x123   :  { %v606_v38 = vpop.permute.xlu1 %605  ;;  %1582 = vmatprep.subr.mxu1 %v1699_v20  ;;  %1639 = vmatprep.mubr.msk.f32.mxu0 %vm1703_vm10, %v1699_v20  ;;  %v597_v41 = vpop.permute.xlu0 %596  ;;  %714 = vst.msk [vmem:[%s2538_s7 + $0x8] sm:$0x7] %vm711_vm3, %v697_v37 }
 0x124   :  { %1583 = vmatpush3.msra.mxu1 %v1974_v14 }
 0x125   :  { %1585 = vmatmul.mubr.msk.f32.vlgmr.msra.gmra.mxu1 %vm413_vm12, %v407_v35  ;;  %1604 = vmatprep.subr.mxu1 %v1699_v20 }
 0x126   :  { %1605 = vmatpush3.msra.mxu1 %v606_v38  ;;  %1618 = vmatprep.mubr.msk.f32.mxu1 %vm1703_vm10, %v1699_v20  ;;  %v698_v38 = vld [vmem:[%s2532_s0 + $0xc] sm:$0x7] }
 0x127   :  { %1606 = vmatprep.subr.mxu1 %v1699_v20  ;;  %v600_v40 = vpop.permute.xlu1 %599  ;;  %715 = vst.msk [vmem:[%s2538_s7 + $0xc] sm:$0x7] %vm711_vm3, %v698_v38 }
 0x128   :  { %1607 = vmatpush3.msra.mxu1 %v603_v39  ;;  %v699_v39 = vld [vmem:[%s2532_s0 + $0x10] sm:$0x7] }
 0x129   :  { %1608 = vmatprep.subr.mxu1 %v1699_v20  ;;  %716 = vst.msk [vmem:[%s2538_s7 + $0x10] sm:$0x7] %vm711_vm3, %v699_v39 }
 0x12a   :  { %1609 = vmatpush3.msra.mxu1 %v600_v40  ;;  %v700_v40 = vld [vmem:[%s2532_s0 + $0x14] sm:$0x7] }
 0x12b   :  { %1610 = vmatprep.subr.mxu1 %v1699_v20  ;;  %v594_v42 = vpop.permute.xlu1 %593  ;;  %717 = vst.msk [vmem:[%s2538_s7 + $0x14] sm:$0x7] %vm711_vm3, %v700_v40 }
 0x12c   :  { %1611 = vmatpush3.msra.mxu1 %v2008_v21 }
 0x12d   :  { %1612 = vmatprep.subr.mxu1 %v1699_v20 }
 0x12e   :  { %1613 = vmatpush3.msra.mxu1 %v597_v41  ;;  %v701_v41 = vld [vmem:[%s2532_s0 + $0x18] sm:$0x7] }
 0x12f   :  { %1614 = vmatprep.subr.mxu1 %v1699_v20  ;;  %718 = vst.msk [vmem:[%s2538_s7 + $0x18] sm:$0x7] %vm711_vm3, %v701_v41 }
 0x130   :  { %1615 = vmatpush3.msra.mxu1 %v594_v42  ;;  %v278_v53 = vpop.permute.xlu0 %277  ;;  %v702_v42 = vld [vmem:[%s2532_s0 + $0x1c] sm:$0x7] }
 0x131   :  { %1616 = vmatprep.subr.mxu1 %v1699_v20  ;;  %719 = vst.msk [vmem:[%s2538_s7 + $0x1c] sm:$0x7] %vm711_vm3, %v702_v42 }
 0x132   :  { %1617 = vmatpush3.msra.mxu1 %v1962_v11 }
 0x133   :  { %1619 = vmatmul.mubr.msk.f32.vlgmr.msra.gmra.mxu1 %vm413_vm12, %v407_v35  ;;  %1642 = vmatprep.subr.mxu1 %v1699_v20  ;;  %v695_v35 = vld [vmem:[%s2532_s0] sm:$0x7] }
 0x134   :  { %1660 = vmatprep.mubr.msk.f32.mxu1 %vm1703_vm10, %v1699_v20  ;;  %v283_v8 = vpop.permute.xlu0 %282  ;;  %712 = vst.msk [vmem:[%s2538_s7] sm:$0x7] %vm711_vm3, %v695_v35 }
 0x138   :  { %v411_v51 = vpop.permute.xlu1 %410 }
 0x13c   :  { %v273_v55 = vpop.permute.xlu1 %272 }
 0x1d1   :  { %v373_v44 = vpop.f32.mrf.mxu1 }
 0x1d2   :  { %v374_v59 = vadd.f32 %v373_v44, %v273_v55  ;;  %v703_v44 = vld [vmem:[%s2532_s0 + $0x20] sm:$0x7] }
 0x1d3   :  { %v1563_v45 = vpop.f32.mrf.mxu1  ;;  %720 = vst.msk [vmem:[%s2538_s7 + $0x40] sm:$0x7] %vm711_vm3, %v703_v44 }
 0x1d4   :  { %v387_v3 = vmax.f32 %v374_v59, 0.0  ;;  %v704_v45 = vld [vmem:[%s2532_s0 + $0x24] sm:$0x7] }
 0x1d5   :  { %v378_v47 = vpop.f32.mrf.mxu1  ;;  %721 = vst.msk [vmem:[%s2538_s7 + $0x44] sm:$0x7] %vm711_vm3, %v704_v45 }
 0x1d6   :  { %v379_v54 = vadd.f32 %v378_v47, %v278_v53  ;;  %v391_v53 = vld [vmem:[%s2537_s6] sm:$0xff] }
 0x1d7   :  { %v1566_v48 = vpop.f32.mrf.mxu1 }
 0x1d8   :  { %v388_v60 = vmax.f32 %v379_v54, 0.0  ;;  %v706_v48 = vld [vmem:[%s2532_s0 + $0x2c] sm:$0x7] }
 0x1d9   :  { %v383_v50 = vpop.f32.mrf.mxu1  ;;  %723 = vst.msk [vmem:[%s2538_s7 + $0x4c] sm:$0x7] %vm711_vm3, %v706_v48 }
 0x1da   :  { %v384_v9 = vadd.f32 %v383_v50, %v283_v8  ;;  %v708_v50 = vld [vmem:[%s2532_s0 + $0x34] sm:$0x7] }
 0x1db   :  { %v1569_v52 = vpop.f32.mrf.mxu1  ;;  %725 = vst.msk [vmem:[%s2538_s7 + $0x54] sm:$0x7] %vm711_vm3, %v708_v50 }
 0x1dc   :  { %v389_v13 = vmax.f32 %v384_v9, 0.0  ;;  %v710_v52 = vld [vmem:[%s2532_s0 + $0x3c] sm:$0x7] }
 0x1dd   :  { %727 = vst.msk [vmem:[%s2538_s7 + $0x5c] sm:$0x7] %vm711_vm3, %v710_v52 }
 0x1e1   :  { %v581_v56 = vpop.f32.mrf.mxu0 }
 0x1e2   :  { %v582_v57 = vadd.f32 %v581_v56, %v411_v51 }
 0x1e3   :  { %v1603_v58 = vpop.f32.mrf.mxu0 }
 0x1e4   :  { %v585_v61 = vmax.f32 %v582_v57, 0.0 }
 0x1e5   :  { %v483_v62 = vpop.f32.mrf.mxu1 }
 0x1e6   :  { %v586_v0 = vadd.f32 %v585_v61, %v388_v60  ;;  %v484_v1 = vadd.f32 %v483_v62, %v411_v51  ;;  %v743_v61 = vld [vmem:[%s2539_s5] sm:$0xff] }
 0x1e7   :  { %v1586_v2 = vpop.f32.mrf.mxu1 }
 0x1e8   :  { %v487_v4 = vmax.f32 %v484_v1, 0.0  ;;  %v587_v5 = vmul.f32 %v1437_v63, %v586_v0  ;;  %v1710_v1 = vmov 1966171168  }
 0x1e9   :  { %v847_v2 = vunpack.c.l.s4 %v1710_v1 }
 0x1ea   :  { %v488_v6 = vadd.f32 %v487_v4, %v387_v3  ;;  %589 = vrot.lane.b32.xlu1 %v587_v5, %s1700_s26  ;;  %v850_v4 = vshrl.u32 %v252_v43, 7 }
 0x1eb   :  { %v848_v3 = vunpack.c.0.s8 %v847_v2 }
 0x1ec   :  { %v489_v7 = vmul.f32 %v1437_v63, %v488_v6 }
 0x1ed   :  { %v2270_v5 = vsub.s32 %v848_v3, %v850_v4 }
 0x1ee   :  { %491 = vrot.lane.b32.xlu0 %v489_v7, %s1700_s26 }
 0x1f3   :  { %v678_v10 = vpop.f32.mrf.mxu1 }
 0x1f4   :  { %v679_v11 = vadd.f32 %v678_v10, %v411_v51  ;;  %v709_v51 = vld [vmem:[%s2532_s0 + $0x38] sm:$0x7]  ;;  %v2272_v10 = vsub.s32 0, %v850_v4 }
 0x1f5   :  { %v1620_v12 = vpop.f32.mrf.mxu1  ;;  %726 = vst.msk [vmem:[%s2538_s7 + $0x58] sm:$0x7] %vm711_vm3, %v709_v51 }
 0x1f6   :  { %v682_v14 = vmax.f32 %v679_v11, 0.0 }
 0x1f8   :  { %v683_v15 = vadd.f32 %v682_v14, %v389_v13 }
 0x1fa   :  { %v684_v16 = vmul.f32 %v1437_v63, %v683_v15 }
 0x1fc   :  { %686 = vrot.lane.b32.xlu1 %v684_v16, %s1700_s26 }
 0x25c   :  { %v590_v17 = vpop.permute.xlu1 %589 }
 0x25d   :  { %592 = vst.msk [vmem:[#allocation3 + $0x10] sm:$0xff] %vm494_vm2, %v590_v17 }
 0x260   :  { %v492_v18 = vpop.permute.xlu0 %491 }
 0x261   :  { %495 = vst.msk [vmem:[#allocation3 + $0x8] sm:$0xff] %vm494_vm2, %v492_v18 }
 0x264   :  { %v692_v19 = vld [vmem:[#allocation3 + $0x10] sm:$0xff] }
 0x265   :  { %741 = vrot.lane.b32.xlu0 %v692_v19, %s1708_s14  ;;  %739 = vrot.lane.b32.xlu1 %v692_v19, %s1707_s13 }
 0x268   :  { %v691_v21 = vld [vmem:[#allocation3 + $0x8] sm:$0xff] }
 0x269   :  { %734 = vrot.lane.b32.xlu1 %v691_v21, %s1707_s13  ;;  %736 = vrot.lane.b32.xlu0 %v691_v21, %s1708_s14 }
 0x26d   :  { %729 = vrot.lane.b32.xlu1 %v690_v22, %s1707_s13  ;;  %731 = vrot.lane.b32.xlu0 %v690_v22, %s1708_s14 }
 0x26e   :  { %v687_v23 = vpop.permute.xlu1 %686 }
 0x26f   :  { %689 = vst.msk [vmem:[#allocation3 + $0x18] sm:$0xff] %vm494_vm2, %v687_v23 }
 0x271   :  { %1196 = vrot.lane.b32.xlu1 %v694_v24, %s1708_s14 }
 0x275   :  { %1194 = vrot.lane.b32.xlu1 %v694_v24, %s1707_s13 }
 0x276   :  { %v693_v25 = vld [vmem:[#allocation3 + $0x18] sm:$0xff] }
 0x277   :  { %980 = vrot.lane.b32.xlu0 %v693_v25, %s1708_s14 }
 0x27b   :  { %978 = vrot.lane.b32.xlu0 %v693_v25, %s1707_s13 }
 0x2d7   :  { %v740_v26 = vpop.permute.xlu1 %739  ;;  %v2087_v27 = vpop.permute.xlu0 %741 }
 0x2d8   :  { %757 = vrot.lane.b32.xlu1 %v740_v26, %s1708_s14  ;;  %759 = vrot.lane.b32.xlu0 %v2087_v27, %s1708_s14 }
 0x2db   :  { %v735_v28 = vpop.permute.xlu1 %734  ;;  %v2092_v29 = vpop.permute.xlu0 %736 }
 0x2dc   :  { %753 = vrot.lane.b32.xlu1 %v735_v28, %s1708_s14  ;;  %755 = vrot.lane.b32.xlu0 %v2092_v29, %s1708_s14 }
 0x2df   :  { %v730_v30 = vpop.permute.xlu1 %729  ;;  %v2097_v31 = vpop.permute.xlu0 %731 }
 0x2e0   :  { %749 = vrot.lane.b32.xlu1 %v730_v30, %s1708_s14  ;;  %751 = vrot.lane.b32.xlu0 %v2097_v31, %s1708_s14 }
 0x2e3   :  { %v2102_v32 = vpop.permute.xlu1 %1196 }
 0x2e4   :  { %1201 = vrot.lane.b32.xlu1 %v2102_v32, %s1708_s14 }
 0x2e7   :  { %v1195_v33 = vpop.permute.xlu1 %1194 }
 0x2e8   :  { %1199 = vrot.lane.b32.xlu1 %v1195_v33, %s1708_s14 }
 0x2e9   :  { %v2107_v34 = vpop.permute.xlu0 %980 }
 0x2ea   :  { %985 = vrot.lane.b32.xlu0 %v2107_v34, %s1708_s14 }
 0x2ed   :  { %v979_v47 = vpop.permute.xlu0 %978 }
 0x2ee   :  { %983 = vrot.lane.b32.xlu0 %v979_v47, %s1708_s14 }
 0x2f2   :  { %746 = vperm.xlu0 %1697, %v391_v53  }
 0x34a   :  { %v758_v54 = vpop.permute.xlu1 %757  ;;  %v760_v55 = vpop.permute.xlu0 %759 }
 0x34b   :  { %1622 = vmatpush3.msra.mxu0 %v760_v55 }
 0x34c   :  { %1623 = vmatprep.subr.mxu0 %v1699_v20 }
 0x34d   :  { %1624 = vmatpush3.msra.mxu0 %v758_v54 }
 0x34e   :  { %v754_v56 = vpop.permute.xlu1 %753  ;;  %1625 = vmatprep.subr.mxu0 %v1699_v20  ;;  %v756_v57 = vpop.permute.xlu0 %755 }
 0x34f   :  { %1626 = vmatpush3.msra.mxu0 %v2087_v27 }
 0x350   :  { %1627 = vmatprep.subr.mxu0 %v1699_v20 }
 0x351   :  { %1628 = vmatpush3.msra.mxu0 %v756_v57 }
 0x352   :  { %1629 = vmatprep.subr.mxu0 %v1699_v20  ;;  %v750_v58 = vpop.permute.xlu1 %749  ;;  %v752_v59 = vpop.permute.xlu0 %751 }
 0x353   :  { %1630 = vmatpush3.msra.mxu0 %v754_v56 }
 0x354   :  { %1631 = vmatprep.subr.mxu0 %v1699_v20 }
 0x355   :  { %1632 = vmatpush3.msra.mxu0 %v2092_v29 }
 0x356   :  { %1633 = vmatprep.subr.mxu0 %v1699_v20  ;;  %v1202_v60 = vpop.permute.xlu1 %1201 }
 0x357   :  { %1634 = vmatpush3.msra.mxu0 %v752_v59 }
 0x358   :  { %1635 = vmatprep.subr.mxu0 %v1699_v20 }
 0x359   :  { %1636 = vmatpush3.msra.mxu0 %v750_v58 }
 0x35a   :  { %1637 = vmatprep.subr.mxu0 %v1699_v20  ;;  %v1200_v63 = vpop.permute.xlu1 %1199 }
 0x35b   :  { %1638 = vmatpush3.msra.mxu0 %v2097_v31 }
 0x35c   :  { %1640 = vmatmul.mubr.msk.f32.vlgmr.msra.gmra.mxu0 %vm770_vm4, %v743_v61  ;;  %1663 = vmatprep.subr.mxu0 %v1699_v20  ;;  %v986_v62 = vpop.permute.xlu0 %985 }
 0x35d   :  { %1643 = vmatpush3.msra.mxu1 %v986_v62  ;;  %1664 = vmatpush3.msra.mxu0 %v1202_v60 }
 0x35e   :  { %1665 = vmatprep.subr.mxu0 %v1699_v20  ;;  %1644 = vmatprep.subr.mxu1 %v1699_v20 }
 0x35f   :  { %1666 = vmatpush3.msra.mxu0 %v1200_v63  ;;  %1681 = vmatprep.mubr.msk.f32.mxu0 %vm1703_vm10, %v1699_v20 }
 0x360   :  { %1667 = vmatprep.subr.mxu0 %v1699_v20  ;;  %v984_v0 = vpop.permute.xlu0 %983 }
 0x361   :  { %1645 = vmatpush3.msra.mxu1 %v984_v0  ;;  %1668 = vmatpush3.msra.mxu0 %v2102_v32 }
 0x362   :  { %1646 = vmatprep.subr.mxu1 %v1699_v20  ;;  %1669 = vmatprep.subr.mxu0 %v1699_v20 }
 0x363   :  { %1647 = vmatpush3.msra.mxu1 %v2107_v34  ;;  %1670 = vmatpush3.msra.mxu0 %v986_v62 }
 0x364   :  { %1648 = vmatprep.subr.mxu1 %v1699_v20  ;;  %1671 = vmatprep.subr.mxu0 %v1699_v20 }
 0x365   :  { %1649 = vmatpush3.msra.mxu1 %v760_v55  ;;  %1672 = vmatpush3.msra.mxu0 %v984_v0 }
 0x366   :  { %1650 = vmatprep.subr.mxu1 %v1699_v20  ;;  %1673 = vmatprep.subr.mxu0 %v1699_v20 }
 0x367   :  { %1651 = vmatpush3.msra.mxu1 %v758_v54  ;;  %1674 = vmatpush3.msra.mxu0 %v2107_v34 }
 0x368   :  { %1652 = vmatprep.subr.mxu1 %v1699_v20  ;;  %1675 = vmatprep.subr.mxu0 %v1699_v20 }
 0x369   :  { %1653 = vmatpush3.msra.mxu1 %v2087_v27  ;;  %1676 = vmatpush3.msra.mxu0 %v760_v55 }
 0x36a   :  { %1654 = vmatprep.subr.mxu1 %v1699_v20  ;;  %1677 = vmatprep.subr.mxu0 %v1699_v20 }
 0x36b   :  { %1655 = vmatpush3.msra.mxu1 %v756_v57  ;;  %1678 = vmatpush3.msra.mxu0 %v758_v54 }
 0x36c   :  { %1656 = vmatprep.subr.mxu1 %v1699_v20  ;;  %1679 = vmatprep.subr.mxu0 %v1699_v20 }
 0x36d   :  { %1657 = vmatpush3.msra.mxu1 %v754_v56  ;;  %1680 = vmatpush3.msra.mxu0 %v2087_v27  ;;  %v747_v6 = vpop.permute.xlu0 %746 }
 0x36e   :  { %1658 = vmatprep.subr.mxu1 %v1699_v20  ;;  %1682 = vmatmul.mubr.msk.f32.vlgmr.msra.gmra.mxu0 %vm770_vm4, %v743_v61 }
 0x36f   :  { %1659 = vmatpush3.msra.mxu1 %v2092_v29 }
 0x370   :  { %1661 = vmatmul.mubr.msk.f32.vlgmr.msra.gmra.mxu1 %vm770_vm4, %v743_v61 }
 0x41c   :  { %v840_v7 = vpop.f32.mrf.mxu0 }
 0x41d   :  { %v841_v8 = vadd.f32 %v840_v7, %v747_v6 }
 0x41e   :  { %v1641_v9 = vpop.f32.mrf.mxu0 }
 0x41f   :  { %v845_v20 = vcombine.high %v841_v8, %v841_v8  ;;  %v852_v11 = vrot.slane %v841_v8, %v2270_v5 }
 0x421   :  { %v859_v12 = vrot.slane %v845_v20, %v2270_v5  ;;  %v860_v13 = vcombine.high %v852_v11, %v852_v11  ;;  %v868_v14 = vrot.slane %v852_v11, %v2270_v5 }
 0x423   :  { %v861_v15 = vcombine.high %v859_v12, %v859_v12  ;;  %v875_v43 = vrot.slane %v859_v12, %v2270_v5  ;;  %v882_v16 = vrot.slane %v860_v13, %v2270_v5  ;;  %1445 = vst.msk [vmem:[%s2538_s7 + $0x20] sm:$0x1] %vm903_vm5, %v868_v14  ;;  %v915_v17 = vrot.slane %v868_v14, %v2272_v10 }
 0x424   :  { %v890_v18 = vcombine.high %v868_v14, %v868_v14 }
 0x425   :  { %1446 = vst.msk [vmem:[%s2538_s7 + $0x24] sm:$0x1] %vm903_vm5, %v882_v16  ;;  %1449 = vst.msk [vmem:[%s2538_s7 + $0x30] sm:$0x1] %vm903_vm5, %v875_v43  ;;  %944 = vrot.lane.b32.xlu1 %v915_v17, %s1711_s20  ;;  %v919_v19 = vrot.slane %v882_v16, %v2272_v10  ;;  %v892_v21 = vcombine.high %v882_v16, %v882_v16  ;;  %v889_v22 = vrot.slane %v861_v15, %v2270_v5 }
 0x426   :  { %1447 = vst.msk [vmem:[%s2538_s7 + $0x28] sm:$0x1] %vm903_vm5, %v890_v18  ;;  %v891_v23 = vcombine.high %v875_v43, %v875_v43  ;;  %v923_v24 = vrot.slane %v890_v18, %v2272_v10  ;;  %v931_v27 = vrot.slane %v875_v43, %v2272_v10 }
 0x427   :  { %946 = vrot.lane.b32.xlu0 %v919_v19, %s1711_s20  ;;  %1448 = vst.msk [vmem:[%s2538_s7 + $0x2c] sm:$0x1] %vm903_vm5, %v892_v21  ;;  %1450 = vst.msk [vmem:[%s2538_s7 + $0x34] sm:$0x1] %vm903_vm5, %v889_v22  ;;  %v893_v25 = vcombine.high %v889_v22, %v889_v22  ;;  %v927_v26 = vrot.slane %v892_v21, %v2272_v10  ;;  %v935_v28 = vrot.slane %v889_v22, %v2272_v10 }
 0x428   :  { %1451 = vst.msk [vmem:[%s2538_s7 + $0x38] sm:$0x1] %vm903_vm5, %v891_v23  ;;  %v939_v31 = vrot.slane %v891_v23, %v2272_v10 }
 0x429   :  { %948 = vrot.lane.b32.xlu1 %v923_v24, %s1711_s20  ;;  %1452 = vst.msk [vmem:[%s2538_s7 + $0x3c] sm:$0x1] %vm903_vm5, %v893_v25  ;;  %v943_v37 = vrot.slane %v893_v25, %v2272_v10 }
 0x42b   :  { %950 = vrot.lane.b32.xlu0 %v927_v26, %s1711_s20 }
 0x42d   :  { %952 = vrot.lane.b32.xlu1 %v931_v27, %s1711_s20 }
 0x42e   :  { %v1275_v29 = vpop.f32.mrf.mxu0 }
 0x42f   :  { %v1276_v30 = vadd.f32 %v1275_v29, %v747_v6  ;;  %954 = vrot.lane.b32.xlu0 %v935_v28, %s1711_s20 }
 0x430   :  { %v1059_v32 = vpop.f32.mrf.mxu1  ;;  %v1683_v33 = vpop.f32.mrf.mxu0 }
 0x431   :  { %v1280_v34 = vcombine.high %v1276_v30, %v1276_v30  ;;  %v1287_v35 = vrot.slane %v1276_v30, %v2270_v5  ;;  %v1060_v36 = vadd.f32 %v1059_v32, %v747_v6  ;;  %956 = vrot.lane.b32.xlu1 %v939_v31, %s1711_s20 }
 0x432   :  { %v1662_v38 = vpop.f32.mrf.mxu1 }
 0x433   :  { %v1294_v39 = vrot.slane %v1280_v34, %v2270_v5  ;;  %v1295_v40 = vcombine.high %v1287_v35, %v1287_v35  ;;  %v1303_v41 = vrot.slane %v1287_v35, %v2270_v5  ;;  %v1064_v42 = vcombine.high %v1060_v36, %v1060_v36  ;;  %958 = vrot.lane.b32.xlu0 %v943_v37, %s1711_s20 }
 0x434   :  { %v1071_v44 = vrot.slane %v1060_v36, %v2270_v5 }
 0x435   :  { %v1296_v45 = vcombine.high %v1294_v39, %v1294_v39  ;;  %v1310_v46 = vrot.slane %v1294_v39, %v2270_v5  ;;  %v1317_v47 = vrot.slane %v1295_v40, %v2270_v5  ;;  %1479 = vst.msk [vmem:[%s2538_s7 + $0x22] sm:$0x1] %vm903_vm5, %v1303_v41  ;;  %v1078_v48 = vrot.slane %v1064_v42, %v2270_v5 }
 0x436   :  { %v1079_v49 = vcombine.high %v1071_v44, %v1071_v44  ;;  %v1087_v50 = vrot.slane %v1071_v44, %v2270_v5  ;;  %v1348_v51 = vrot.slane %v1303_v41, %v2272_v10  ;;  %v1325_v52 = vcombine.high %v1303_v41, %v1303_v41 }
 0x437   :  { %1480 = vst.msk [vmem:[%s2538_s7 + $0x26] sm:$0x1] %vm903_vm5, %v1317_v47  ;;  %1483 = vst.msk [vmem:[%s2538_s7 + $0x32] sm:$0x1] %vm903_vm5, %v1310_v46  ;;  %v1080_v53 = vcombine.high %v1078_v48, %v1078_v48  ;;  %v1094_v54 = vrot.slane %v1078_v48, %v2270_v5  ;;  %v1352_v55 = vrot.slane %v1317_v47, %v2272_v10 }
 0x438   :  { %v1327_v56 = vcombine.high %v1317_v47, %v1317_v47  ;;  %v1101_v57 = vrot.slane %v1079_v49, %v2270_v5  ;;  %1462 = vst.msk [vmem:[%s2538_s7 + $0x21] sm:$0x1] %vm903_vm5, %v1087_v50  ;;  %1377 = vrot.lane.b32.xlu1 %v1348_v51, %s1711_s20  ;;  %1481 = vst.msk [vmem:[%s2538_s7 + $0x2a] sm:$0x1] %vm903_vm5, %v1325_v52  ;;  %v1324_v58 = vrot.slane %v1296_v45, %v2270_v5 }
 0x439   :  { %1466 = vst.msk [vmem:[%s2538_s7 + $0x31] sm:$0x1] %vm903_vm5, %v1094_v54  ;;  %1379 = vrot.lane.b32.xlu0 %v1352_v55, %s1711_s20  ;;  %v1109_v59 = vcombine.high %v1087_v50, %v1087_v50  ;;  %v1132_v60 = vrot.slane %v1087_v50, %v2272_v10  ;;  %v1108_v62 = vrot.slane %v1080_v53, %v2270_v5 }
 0x43a   :  { %1482 = vst.msk [vmem:[%s2538_s7 + $0x2e] sm:$0x1] %vm903_vm5, %v1327_v56  ;;  %1463 = vst.msk [vmem:[%s2538_s7 + $0x25] sm:$0x1] %vm903_vm5, %v1101_v57  ;;  %v1111_v61 = vcombine.high %v1101_v57, %v1101_v57  ;;  %v1110_v63 = vcombine.high %v1094_v54, %v1094_v54  ;;  %v1136_v0 = vrot.slane %v1101_v57, %v2272_v10 }
 0x43b   :  { %1484 = vst.msk [vmem:[%s2538_s7 + $0x36] sm:$0x1] %vm903_vm5, %v1324_v58  ;;  %1464 = vst.msk [vmem:[%s2538_s7 + $0x29] sm:$0x1] %vm903_vm5, %v1109_v59  ;;  %v1326_v1 = vcombine.high %v1310_v46, %v1310_v46  ;;  %v1328_v2 = vcombine.high %v1324_v58, %v1324_v58  ;;  %v1112_v3 = vcombine.high %v1108_v62, %v1108_v62 }
 0x43c   :  { %1161 = vrot.lane.b32.xlu1 %v1132_v60, %s1711_s20  ;;  %1465 = vst.msk [vmem:[%s2538_s7 + $0x2d] sm:$0x1] %vm903_vm5, %v1111_v61  ;;  %1467 = vst.msk [vmem:[%s2538_s7 + $0x35] sm:$0x1] %vm903_vm5, %v1108_v62  ;;  %v1356_v4 = vrot.slane %v1325_v52, %v2272_v10  ;;  %v1360_v5 = vrot.slane %v1327_v56, %v2272_v10  ;;  %v1364_v6 = vrot.slane %v1310_v46, %v2272_v10 }
 0x43d   :  { %1468 = vst.msk [vmem:[%s2538_s7 + $0x39] sm:$0x1] %vm903_vm5, %v1110_v63  ;;  %1163 = vrot.lane.b32.xlu0 %v1136_v0, %s1711_s20  ;;  %1485 = vst.msk [vmem:[%s2538_s7 + $0x3a] sm:$0x1] %vm903_vm5, %v1326_v1  ;;  %v1368_v7 = vrot.slane %v1324_v58, %v2272_v10  ;;  %v1140_v8 = vrot.slane %v1109_v59, %v2272_v10  ;;  %v1144_v9 = vrot.slane %v1111_v61, %v2272_v10 }
 0x43e   :  { %1486 = vst.msk [vmem:[%s2538_s7 + $0x3e] sm:$0x1] %vm903_vm5, %v1328_v2  ;;  %1469 = vst.msk [vmem:[%s2538_s7 + $0x3d] sm:$0x1] %vm903_vm5, %v1112_v3  ;;  %v1148_v20 = vrot.slane %v1094_v54, %v2272_v10  ;;  %v1152_v11 = vrot.slane %v1108_v62, %v2272_v10  ;;  %v1156_v12 = vrot.slane %v1110_v63, %v2272_v10 }
 0x43f   :  { %v1160_v13 = vrot.slane %v1112_v3, %v2272_v10  ;;  %v1372_v14 = vrot.slane %v1326_v1, %v2272_v10  ;;  %v1376_v15 = vrot.slane %v1328_v2, %v2272_v10 }
 0x440   :  { %1381 = vrot.lane.b32.xlu1 %v1356_v4, %s1711_s20 }
 0x441   :  { %1383 = vrot.lane.b32.xlu0 %v1360_v5, %s1711_s20 }
 0x444   :  { %1385 = vrot.lane.b32.xlu1 %v1364_v6, %s1711_s20 }
 0x445   :  { %1387 = vrot.lane.b32.xlu0 %v1368_v7, %s1711_s20 }
 0x448   :  { %1165 = vrot.lane.b32.xlu1 %v1140_v8, %s1711_s20 }
 0x449   :  { %1167 = vrot.lane.b32.xlu0 %v1144_v9, %s1711_s20 }
 0x44c   :  { %1169 = vrot.lane.b32.xlu1 %v1148_v20, %s1711_s20 }
 0x44d   :  { %1171 = vrot.lane.b32.xlu0 %v1152_v11, %s1711_s20 }
 0x450   :  { %1173 = vrot.lane.b32.xlu1 %v1156_v12, %s1711_s20 }
 0x451   :  { %1175 = vrot.lane.b32.xlu0 %v1160_v13, %s1711_s20 }
 0x454   :  { %1389 = vrot.lane.b32.xlu1 %v1372_v14, %s1711_s20 }
 0x455   :  { %1391 = vrot.lane.b32.xlu0 %v1376_v15, %s1711_s20 }
 0x497   :  { %v945_v43 = vpop.permute.xlu1 %944 }
 0x498   :  { %1453 = vst.msk [vmem:[%s2538_s7 + $0x60] sm:$0x1] %vm903_vm5, %v945_v43 }
 0x499   :  { %v947_v16 = vpop.permute.xlu0 %946 }
 0x49a   :  { %1454 = vst.msk [vmem:[%s2538_s7 + $0x64] sm:$0x1] %vm903_vm5, %v947_v16 }
 0x49b   :  { %v949_v17 = vpop.permute.xlu1 %948 }
 0x49c   :  { %1455 = vst.msk [vmem:[%s2538_s7 + $0x68] sm:$0x1] %vm903_vm5, %v949_v17 }
 0x49d   :  { %v951_v10 = vpop.permute.xlu0 %950 }
 0x49e   :  { %1456 = vst.msk [vmem:[%s2538_s7 + $0x6c] sm:$0x1] %vm903_vm5, %v951_v10 }
 0x49f   :  { %v953_v18 = vpop.permute.xlu1 %952 }
 0x4a0   :  { %1457 = vst.msk [vmem:[%s2538_s7 + $0x70] sm:$0x1] %vm903_vm5, %v953_v18 }
 0x4a1   :  { %v955_v19 = vpop.permute.xlu0 %954 }
 0x4a2   :  { %1458 = vst.msk [vmem:[%s2538_s7 + $0x74] sm:$0x1] %vm903_vm5, %v955_v19 }
 0x4a3   :  { %v957_v21 = vpop.permute.xlu1 %956 }
 0x4a4   :  { %1459 = vst.msk [vmem:[%s2538_s7 + $0x78] sm:$0x1] %vm903_vm5, %v957_v21 }
 0x4a5   :  { %v959_v22 = vpop.permute.xlu0 %958 }
 0x4a6   :  { %1460 = vst.msk [vmem:[%s2538_s7 + $0x7c] sm:$0x1] %vm903_vm5, %v959_v22 }
 0x4aa   :  { %v1378_v23 = vpop.permute.xlu1 %1377 }
 0x4ab   :  { %1487 = vst.msk [vmem:[%s2538_s7 + $0x62] sm:$0x1] %vm903_vm5, %v1378_v23  ;;  %v1380_v24 = vpop.permute.xlu0 %1379 }
 0x4ac   :  { %1488 = vst.msk [vmem:[%s2538_s7 + $0x66] sm:$0x1] %vm903_vm5, %v1380_v24 }
 0x4ae   :  { %v1162_v25 = vpop.permute.xlu1 %1161 }
 0x4af   :  { %1470 = vst.msk [vmem:[%s2538_s7 + $0x61] sm:$0x1] %vm903_vm5, %v1162_v25  ;;  %v1164_v26 = vpop.permute.xlu0 %1163 }
 0x4b0   :  { %1471 = vst.msk [vmem:[%s2538_s7 + $0x65] sm:$0x1] %vm903_vm5, %v1164_v26 }
 0x4b2   :  { %v1382_v27 = vpop.permute.xlu1 %1381 }
 0x4b3   :  { %1489 = vst.msk [vmem:[%s2538_s7 + $0x6a] sm:$0x1] %vm903_vm5, %v1382_v27  ;;  %v1384_v28 = vpop.permute.xlu0 %1383 }
 0x4b4   :  { %1490 = vst.msk [vmem:[%s2538_s7 + $0x6e] sm:$0x1] %vm903_vm5, %v1384_v28 }
 0x4b6   :  { %v1386_v29 = vpop.permute.xlu1 %1385 }
 0x4b7   :  { %1491 = vst.msk [vmem:[%s2538_s7 + $0x72] sm:$0x1] %vm903_vm5, %v1386_v29  ;;  %v1388_v30 = vpop.permute.xlu0 %1387 }
 0x4b8   :  { %1492 = vst.msk [vmem:[%s2538_s7 + $0x76] sm:$0x1] %vm903_vm5, %v1388_v30 }
 0x4ba   :  { %v1166_v31 = vpop.permute.xlu1 %1165 }
 0x4bb   :  { %1472 = vst.msk [vmem:[%s2538_s7 + $0x69] sm:$0x1] %vm903_vm5, %v1166_v31  ;;  %v1168_v32 = vpop.permute.xlu0 %1167 }
 0x4bc   :  { %1473 = vst.msk [vmem:[%s2538_s7 + $0x6d] sm:$0x1] %vm903_vm5, %v1168_v32 }
 0x4be   :  { %v1170_v33 = vpop.permute.xlu1 %1169 }
 0x4bf   :  { %1474 = vst.msk [vmem:[%s2538_s7 + $0x71] sm:$0x1] %vm903_vm5, %v1170_v33  ;;  %v1172_v34 = vpop.permute.xlu0 %1171 }
 0x4c0   :  { %1475 = vst.msk [vmem:[%s2538_s7 + $0x75] sm:$0x1] %vm903_vm5, %v1172_v34 }
 0x4c2   :  { %v1174_v35 = vpop.permute.xlu1 %1173 }
 0x4c3   :  { %1476 = vst.msk [vmem:[%s2538_s7 + $0x79] sm:$0x1] %vm903_vm5, %v1174_v35  ;;  %v1176_v36 = vpop.permute.xlu0 %1175 }
 0x4c4   :  { %1477 = vst.msk [vmem:[%s2538_s7 + $0x7d] sm:$0x1] %vm903_vm5, %v1176_v36 }
 0x4c6   :  { %v1390_v37 = vpop.permute.xlu1 %1389 }
 0x4c7   :  { %1493 = vst.msk [vmem:[%s2538_s7 + $0x7a] sm:$0x1] %vm903_vm5, %v1390_v37  ;;  %v1392_v38 = vpop.permute.xlu0 %1391 }
 0x4c8   :  { %1494 = vst.msk [vmem:[%s2538_s7 + $0x7e] sm:$0x1] %vm903_vm5, %v1392_v38 }

</bundles_post_ra>
